<compile_context>
chip_gen: v7x
topology: tpu7x:2x2x1
jax: 0.10.0
libtpu: 0.0.40
codegen_flags: <defaults>
</compile_context>

<pallas_src>
import functools

import jax
import jax.numpy as jnp
import numpy as np
from jax import lax
from jax.experimental import pallas as pl
from jax.experimental.pallas import tpu as pltpu

_UNROLL = 8  # time steps per unrolled group / per dense output store


def _round_up(x, m):
    return ((x + m - 1) // m) * m


def _notrade_rnn_kernel(params_ref, x_ref, ret_ref, out_ref, h_ref):
    """One (batch_block, time_block) grid step of the recurrence.

    params_ref (SMEM, f32[7]) : [w_in, w_h, w_fc1, w_fc2,
                                 pi_bar - b_h, 2*b_h, pi_bar + b_h]
    x_ref      (VMEM, f32[tT, bB]) : inputs, time-major, batch on lanes
    ret_ref    (VMEM, f32[tT, bB]) : returns shifted so row t holds ret[t-1]
    out_ref    (VMEM, f32[tT, bB]) : per-step hidden states
    h_ref      (VMEM scratch, f32[1, bB]) : hidden carried across time blocks
    """
    w_in = params_ref[0]
    w_h = params_ref[1]
    w_fc1 = params_ref[2]
    w_fc2 = params_ref[3]
    c0 = params_ref[4]  # pi_bar - b_h
    c1 = params_ref[5]  # 2 * b_h
    c2 = params_ref[6]  # pi_bar + b_h

    ti = pl.program_id(1)
    t_block = x_ref.shape[0]
    n_groups = t_block // _UNROLL

    def recurrence(x_row, r_row, h):
        # wealth-rebalancing adjustment of the previous hidden state
        h_adj = h * (1.0 + r_row) * pl.reciprocal(1.0 + h * r_row, approx=False)
        # recurrence() from the PyTorch module (all Linear layers are 1x1)
        ingate = jnp.maximum(w_in * x_row + w_h * h_adj - c0, 0.0)
        ingate2 = jnp.maximum(w_fc1 * ingate + c1, 0.0)
        return w_fc2 * ingate2 + c2

    def group_body(g, h):
        # 8 recurrence steps, h carried in vregs; one dense (8, bB) store.
        base = pl.multiple_of(g * _UNROLL, _UNROLL)
        rows = []
        for j in range(_UNROLL):
            h = recurrence(x_ref[base + j, :], ret_ref[base + j, :], h)
            rows.append(h)
        out_ref[pl.ds(base, _UNROLL), :] = jnp.stack(rows, axis=0)
        return h

    @pl.when(ti == 0)
    def _():
        # Global step 0: hidden = input[0] (H == 1), output[0] = input[0].
        h = x_ref[0, :]
        rows = [h]
        for j in range(1, _UNROLL):
            h = recurrence(x_ref[j, :], ret_ref[j, :], h)
            rows.append(h)
        out_ref[pl.ds(0, _UNROLL), :] = jnp.stack(rows, axis=0)
        h = lax.fori_loop(1, n_groups, group_body, h)
        h_ref[0, :] = h

    @pl.when(ti != 0)
    def _():
        h = lax.fori_loop(0, n_groups, group_body, h_ref[0, :])
        h_ref[0, :] = h


@functools.partial(jax.jit, static_argnames=("t_block_target",))
def _notrade_rnn_pallas(p, x2, ret2, *, t_block_target=512):
    T_pad, B_pad = x2.shape
    t_block = min(t_block_target, T_pad)
    b_block = B_pad if B_pad <= 1024 else (1024 if B_pad % 1024 == 0 else 128)
    grid = (B_pad // b_block, T_pad // t_block)

    return pl.pallas_call(
        _notrade_rnn_kernel,
        out_shape=jax.ShapeDtypeStruct((T_pad, B_pad), jnp.float32),
        grid_spec=pltpu.PrefetchScalarGridSpec(
            num_scalar_prefetch=1,
            grid=grid,
            in_specs=[
                pl.BlockSpec((t_block, b_block), lambda bi, ti, prm: (ti, bi)),
                pl.BlockSpec((t_block, b_block), lambda bi, ti, prm: (ti, bi)),
            ],
            out_specs=pl.BlockSpec((t_block, b_block), lambda bi, ti, prm: (ti, bi)),
            scratch_shapes=[pltpu.VMEM((1, b_block), jnp.float32)],
        ),
        compiler_params=pltpu.CompilerParams(
            dimension_semantics=("parallel", "arbitrary"),
        ),
    )(p, x2, ret2)


def notrade_region_rnn_forward(x, target, returns, hidden, params):
    """Pallas forward of NoTradeRegionRNN.

    x:       f32[T, B, 1]   (input_size == 1)
    target:  python float (pi_bar)
    returns: f32 array with (T-1)*B elements (view'd to (T-1, B, 1), as in PyTorch)
    hidden:  f32[1, B, 1]   (ignored: overwritten at step 0, as in PyTorch)
    params:  dict with w_in(1,1), w_h(1,1), b_h(1,), w_fc1(1,1), w_fc2(1,1)
    returns: (output f32[T, B, 1], hidden f32[1, B, 1])
    """
    T, B, H = x.shape
    assert H == 1, "forward only shape-checks for hidden_size == input_size == 1"
    del hidden  # never read before being overwritten in the PyTorch forward

    # Padded, lane-dense (time, batch) layout.
    t_block = min(512, _round_up(T, _UNROLL))      # multiple of 8
    T_pad = _round_up(T, t_block)
    B_pad = _round_up(B, 128)

    x_tb = x.astype(jnp.float32)[..., 0]                       # (T, B)
    ret_tb = returns.astype(jnp.float32).reshape(T - 1, B)     # (T-1, B)

    x2 = jnp.zeros((T_pad, B_pad), jnp.float32).at[:T, :B].set(x_tb)
    # Shift returns so row t holds myret[t-1]; row 0 is unused.
    ret2 = jnp.zeros((T_pad, B_pad), jnp.float32).at[1:T, :B].set(ret_tb)

    w_in = params["w_in"][0, 0]
    w_h = params["w_h"][0, 0]
    b_h = params["b_h"][0]
    w_fc1 = params["w_fc1"][0, 0]
    w_fc2 = params["w_fc2"][0, 0]
    pi = jnp.asarray(target, jnp.float32)
    p = jnp.stack(
        [w_in, w_h, w_fc1, w_fc2, pi - b_h, 2.0 * b_h, pi + b_h]
    ).astype(jnp.float32)

    out2 = _notrade_rnn_pallas(p, x2, ret2, t_block_target=t_block)

    output = out2[:T, :B].reshape(T, B, 1)
    hidden_out = output[-1:]  # equals the final recurrence output, shape (1, B, 1)
    return output, hidden_out


def notrade_region_rnn_reference(x, target, returns, hidden, params):
    """Plain-JAX transliteration of the PyTorch forward (for validation)."""
    T, B, H = x.shape
    del hidden
    pi = jnp.asarray(target, jnp.float32)
    W_in, W_h, b_h = params["w_in"], params["w_h"], params["b_h"]
    W_fc1, W_fc2 = params["w_fc1"], params["w_fc2"]
    myret = returns.reshape(T - 1, B, H)
    h = x[0] * jnp.ones((H, B, H), jnp.float32)
    outs = [h]
    for i in range(1, T):
        h_adj = h * (1.0 + myret[i - 1]) / (1.0 + h * myret[i - 1])
        ingate = x[i] @ W_in.T + W_h * h_adj - (pi - b_h)
        ingate2 = W_fc1 * jax.nn.relu(ingate) + 2.0 * b_h
        h = W_fc2 * jax.nn.relu(ingate2) + pi + b_h
        outs.append(h)
    out = jnp.concatenate(outs, 0).reshape(T, B, H)
    return out, h


if __name__ == "__main__":
    key = jax.random.PRNGKey(0)
    T, B = 8, 8      # seq length, batch_size
    I, Hd = 1, 1     # input_size == hidden_size == 1 (forced by the forward's view/broadcast)

    k = jax.random.split(key, 7)
    params = {
        "w_in":  jax.random.uniform(k[0], (Hd, I), jnp.float32, -1.0, 1.0),
        "w_h":   jax.random.uniform(k[1], (Hd, Hd), jnp.float32, -1.0, 1.0),
        "b_h":   jax.random.uniform(k[2], (Hd,), jnp.float32, -1.0, 1.0),
        "w_fc1": jax.random.uniform(k[3], (Hd, Hd), jnp.float32, -1.0, 1.0),
        "w_fc2": jax.random.uniform(k[4], (Hd, Hd), jnp.float32, -1.0, 1.0),
    }

    x = jax.random.uniform(k[5], (T, B, I), jnp.float32, 0.0, 1.0)
    returns = 0.02 * jax.random.normal(k[6], ((T - 1) * B * Hd,), jnp.float32)
    hidden0 = jnp.zeros((1, B, Hd), jnp.float32)
    target = 0.3

    out, h_last = notrade_region_rnn_forward(x, target, returns, hidden0, params)
    out = jax.block_until_ready(out)
    h_last = jax.block_until_ready(h_last)

    ref_out, ref_h = notrade_region_rnn_reference(x, target, returns, hidden0, params)
    np.testing.assert_allclose(np.asarray(out), np.asarray(ref_out), rtol=1e-5, atol=1e-5)
    np.testing.assert_allclose(np.asarray(h_last), np.asarray(ref_h), rtol=1e-5, atol=1e-5)

    print("KERNEL_OK")
</pallas_src>

<mosaic_0001>
module attributes {stable_mosaic.version = 11 : i64} {
  func.func @_notrade_rnn_kernel(%arg0: i32, %arg1: i32, %arg2: memref<7xf32, #tpu.memory_space<smem>>, %arg3: memref<8x128xf32, #tpu.memory_space<vmem>>, %arg4: memref<8x128xf32, #tpu.memory_space<vmem>>, %arg5: memref<8x128xf32, #tpu.memory_space<vmem>>, %arg6: memref<1x128xf32, #tpu.memory_space<vmem>>) attributes {dimension_semantics = [#tpu.dimension_semantics<parallel>, #tpu.dimension_semantics<arbitrary>], iteration_bounds = array<i64: 1, 1>, scalar_prefetch = 1 : i64, scratch_operands = 1 : i64, tpu.core_type = #tpu.core_type<tc>, window_params = [{transform_indices = @transform_0, window_bounds = array<i64: 8, 128>}, {transform_indices = @transform_1, window_bounds = array<i64: 8, 128>}, {transform_indices = @transform_2, window_bounds = array<i64: 8, 128>}]} {
    %c0 = arith.constant 0 : index
    %0 = memref.load %arg2[%c0] : memref<7xf32, #tpu.memory_space<smem>>
    %c1 = arith.constant 1 : index
    %1 = memref.load %arg2[%c1] : memref<7xf32, #tpu.memory_space<smem>>
    %c2 = arith.constant 2 : index
    %2 = memref.load %arg2[%c2] : memref<7xf32, #tpu.memory_space<smem>>
    %c3 = arith.constant 3 : index
    %3 = memref.load %arg2[%c3] : memref<7xf32, #tpu.memory_space<smem>>
    %c4 = arith.constant 4 : index
    %4 = memref.load %arg2[%c4] : memref<7xf32, #tpu.memory_space<smem>>
    %c5 = arith.constant 5 : index
    %5 = memref.load %arg2[%c5] : memref<7xf32, #tpu.memory_space<smem>>
    %c6 = arith.constant 6 : index
    %6 = memref.load %arg2[%c6] : memref<7xf32, #tpu.memory_space<smem>>
    %c0_i32 = arith.constant 0 : i32
    %7 = arith.cmpi eq, %arg1, %c0_i32 : i32
    %8 = arith.extui %7 : i1 to i32
    %c0_i32_0 = arith.constant 0 : i32
    %9 = arith.cmpi ne, %8, %c0_i32_0 : i32
    scf.if %9 {
      %c0_3 = arith.constant 0 : index
      %c0_4 = arith.constant 0 : index
      %13 = vector.load %arg3[%c0_3, %c0_4] : memref<8x128xf32, #tpu.memory_space<vmem>>, vector<1x128xf32>
      %14 = vector.shape_cast %13 : vector<1x128xf32> to vector<128xf32>
      %c1_5 = arith.constant 1 : index
      %c0_6 = arith.constant 0 : index
      %15 = vector.load %arg3[%c1_5, %c0_6] : memref<8x128xf32, #tpu.memory_space<vmem>>, vector<1x128xf32>
      %16 = vector.shape_cast %15 : vector<1x128xf32> to vector<128xf32>
      %c1_7 = arith.constant 1 : index
      %c0_8 = arith.constant 0 : index
      %17 = vector.load %arg4[%c1_7, %c0_8] : memref<8x128xf32, #tpu.memory_space<vmem>>, vector<1x128xf32>
      %18 = vector.shape_cast %17 : vector<1x128xf32> to vector<128xf32>
      %cst = arith.constant 1.000000e+00 : f32
      %19 = vector.broadcast %cst : f32 to vector<128xf32>
      %20 = arith.addf %19, %18 : vector<128xf32>
      %21 = arith.mulf %14, %20 : vector<128xf32>
      %22 = arith.mulf %14, %18 : vector<128xf32>
      %cst_9 = arith.constant 1.000000e+00 : f32
      %23 = vector.broadcast %cst_9 : f32 to vector<128xf32>
      %24 = arith.addf %23, %22 : vector<128xf32>
      %25 = tpu.reciprocal %24 : vector<128xf32> -> vector<128xf32>
      %26 = arith.mulf %21, %25 : vector<128xf32>
      %27 = vector.broadcast %0 : f32 to vector<128xf32>
      %28 = arith.mulf %27, %16 : vector<128xf32>
      %29 = vector.broadcast %1 : f32 to vector<128xf32>
      %30 = arith.mulf %29, %26 : vector<128xf32>
      %31 = arith.addf %28, %30 : vector<128xf32>
      %32 = vector.broadcast %4 : f32 to vector<128xf32>
      %33 = arith.subf %31, %32 : vector<128xf32>
      %cst_10 = arith.constant 0.000000e+00 : f32
      %34 = vector.broadcast %cst_10 : f32 to vector<128xf32>
      %35 = arith.maximumf %33, %34 : vector<128xf32>
      %36 = vector.broadcast %2 : f32 to vector<128xf32>
      %37 = arith.mulf %36, %35 : vector<128xf32>
      %38 = vector.broadcast %5 : f32 to vector<128xf32>
      %39 = arith.addf %37, %38 : vector<128xf32>
      %cst_11 = arith.constant 0.000000e+00 : f32
      %40 = vector.broadcast %cst_11 : f32 to vector<128xf32>
      %41 = arith.maximumf %39, %40 : vector<128xf32>
      %42 = vector.broadcast %3 : f32 to vector<128xf32>
      %43 = arith.mulf %42, %41 : vector<128xf32>
      %44 = vector.broadcast %6 : f32 to vector<128xf32>
      %45 = arith.addf %43, %44 : vector<128xf32>
      %c2_12 = arith.constant 2 : index
      %c0_13 = arith.constant 0 : index
      %46 = vector.load %arg3[%c2_12, %c0_13] : memref<8x128xf32, #tpu.memory_space<vmem>>, vector<1x128xf32>
      %47 = vector.shape_cast %46 : vector<1x128xf32> to vector<128xf32>
      %c2_14 = arith.constant 2 : index
      %c0_15 = arith.constant 0 : index
      %48 = vector.load %arg4[%c2_14, %c0_15] : memref<8x128xf32, #tpu.memory_space<vmem>>, vector<1x128xf32>
      %49 = vector.shape_cast %48 : vector<1x128xf32> to vector<128xf32>
      %cst_16 = arith.constant 1.000000e+00 : f32
      %50 = vector.broadcast %cst_16 : f32 to vector<128xf32>
      %51 = arith.addf %50, %49 : vector<128xf32>
      %52 = arith.mulf %45, %51 : vector<128xf32>
      %53 = arith.mulf %45, %49 : vector<128xf32>
      %cst_17 = arith.constant 1.000000e+00 : f32
      %54 = vector.broadcast %cst_17 : f32 to vector<128xf32>
      %55 = arith.addf %54, %53 : vector<128xf32>
      %56 = tpu.reciprocal %55 : vector<128xf32> -> vector<128xf32>
      %57 = arith.mulf %52, %56 : vector<128xf32>
      %58 = vector.broadcast %0 : f32 to vector<128xf32>
      %59 = arith.mulf %58, %47 : vector<128xf32>
      %60 = vector.broadcast %1 : f32 to vector<128xf32>
      %61 = arith.mulf %60, %57 : vector<128xf32>
      %62 = arith.addf %59, %61 : vector<128xf32>
      %63 = vector.broadcast %4 : f32 to vector<128xf32>
      %64 = arith.subf %62, %63 : vector<128xf32>
      %cst_18 = arith.constant 0.000000e+00 : f32
      %65 = vector.broadcast %cst_18 : f32 to vector<128xf32>
      %66 = arith.maximumf %64, %65 : vector<128xf32>
      %67 = vector.broadcast %2 : f32 to vector<128xf32>
      %68 = arith.mulf %67, %66 : vector<128xf32>
      %69 = vector.broadcast %5 : f32 to vector<128xf32>
      %70 = arith.addf %68, %69 : vector<128xf32>
      %cst_19 = arith.constant 0.000000e+00 : f32
      %71 = vector.broadcast %cst_19 : f32 to vector<128xf32>
      %72 = arith.maximumf %70, %71 : vector<128xf32>
      %73 = vector.broadcast %3 : f32 to vector<128xf32>
      %74 = arith.mulf %73, %72 : vector<128xf32>
      %75 = vector.broadcast %6 : f32 to vector<128xf32>
      %76 = arith.addf %74, %75 : vector<128xf32>
      %c3_20 = arith.constant 3 : index
      %c0_21 = arith.constant 0 : index
      %77 = vector.load %arg3[%c3_20, %c0_21] : memref<8x128xf32, #tpu.memory_space<vmem>>, vector<1x128xf32>
      %78 = vector.shape_cast %77 : vector<1x128xf32> to vector<128xf32>
      %c3_22 = arith.constant 3 : index
      %c0_23 = arith.constant 0 : index
      %79 = vector.load %arg4[%c3_22, %c0_23] : memref<8x128xf32, #tpu.memory_space<vmem>>, vector<1x128xf32>
      %80 = vector.shape_cast %79 : vector<1x128xf32> to vector<128xf32>
      %cst_24 = arith.constant 1.000000e+00 : f32
      %81 = vector.broadcast %cst_24 : f32 to vector<128xf32>
      %82 = arith.addf %81, %80 : vector<128xf32>
      %83 = arith.mulf %76, %82 : vector<128xf32>
      %84 = arith.mulf %76, %80 : vector<128xf32>
      %cst_25 = arith.constant 1.000000e+00 : f32
      %85 = vector.broadcast %cst_25 : f32 to vector<128xf32>
      %86 = arith.addf %85, %84 : vector<128xf32>
      %87 = tpu.reciprocal %86 : vector<128xf32> -> vector<128xf32>
      %88 = arith.mulf %83, %87 : vector<128xf32>
      %89 = vector.broadcast %0 : f32 to vector<128xf32>
      %90 = arith.mulf %89, %78 : vector<128xf32>
      %91 = vector.broadcast %1 : f32 to vector<128xf32>
      %92 = arith.mulf %91, %88 : vector<128xf32>
      %93 = arith.addf %90, %92 : vector<128xf32>
      %94 = vector.broadcast %4 : f32 to vector<128xf32>
      %95 = arith.subf %93, %94 : vector<128xf32>
      %cst_26 = arith.constant 0.000000e+00 : f32
      %96 = vector.broadcast %cst_26 : f32 to vector<128xf32>
      %97 = arith.maximumf %95, %96 : vector<128xf32>
      %98 = vector.broadcast %2 : f32 to vector<128xf32>
      %99 = arith.mulf %98, %97 : vector<128xf32>
      %100 = vector.broadcast %5 : f32 to vector<128xf32>
      %101 = arith.addf %99, %100 : vector<128xf32>
      %cst_27 = arith.constant 0.000000e+00 : f32
      %102 = vector.broadcast %cst_27 : f32 to vector<128xf32>
      %103 = arith.maximumf %101, %102 : vector<128xf32>
      %104 = vector.broadcast %3 : f32 to vector<128xf32>
      %105 = arith.mulf %104, %103 : vector<128xf32>
      %106 = vector.broadcast %6 : f32 to vector<128xf32>
      %107 = arith.addf %105, %106 : vector<128xf32>
      %c4_28 = arith.constant 4 : index
      %c0_29 = arith.constant 0 : index
      %108 = vector.load %arg3[%c4_28, %c0_29] : memref<8x128xf32, #tpu.memory_space<vmem>>, vector<1x128xf32>
      %109 = vector.shape_cast %108 : vector<1x128xf32> to vector<128xf32>
      %c4_30 = arith.constant 4 : index
      %c0_31 = arith.constant 0 : index
      %110 = vector.load %arg4[%c4_30, %c0_31] : memref<8x128xf32, #tpu.memory_space<vmem>>, vector<1x128xf32>
      %111 = vector.shape_cast %110 : vector<1x128xf32> to vector<128xf32>
      %cst_32 = arith.constant 1.000000e+00 : f32
      %112 = vector.broadcast %cst_32 : f32 to vector<128xf32>
      %113 = arith.addf %112, %111 : vector<128xf32>
      %114 = arith.mulf %107, %113 : vector<128xf32>
      %115 = arith.mulf %107, %111 : vector<128xf32>
      %cst_33 = arith.constant 1.000000e+00 : f32
      %116 = vector.broadcast %cst_33 : f32 to vector<128xf32>
      %117 = arith.addf %116, %115 : vector<128xf32>
      %118 = tpu.reciprocal %117 : vector<128xf32> -> vector<128xf32>
      %119 = arith.mulf %114, %118 : vector<128xf32>
      %120 = vector.broadcast %0 : f32 to vector<128xf32>
      %121 = arith.mulf %120, %109 : vector<128xf32>
      %122 = vector.broadcast %1 : f32 to vector<128xf32>
      %123 = arith.mulf %122, %119 : vector<128xf32>
      %124 = arith.addf %121, %123 : vector<128xf32>
      %125 = vector.broadcast %4 : f32 to vector<128xf32>
      %126 = arith.subf %124, %125 : vector<128xf32>
      %cst_34 = arith.constant 0.000000e+00 : f32
      %127 = vector.broadcast %cst_34 : f32 to vector<128xf32>
      %128 = arith.maximumf %126, %127 : vector<128xf32>
      %129 = vector.broadcast %2 : f32 to vector<128xf32>
      %130 = arith.mulf %129, %128 : vector<128xf32>
      %131 = vector.broadcast %5 : f32 to vector<128xf32>
      %132 = arith.addf %130, %131 : vector<128xf32>
      %cst_35 = arith.constant 0.000000e+00 : f32
      %133 = vector.broadcast %cst_35 : f32 to vector<128xf32>
      %134 = arith.maximumf %132, %133 : vector<128xf32>
      %135 = vector.broadcast %3 : f32 to vector<128xf32>
      %136 = arith.mulf %135, %134 : vector<128xf32>
      %137 = vector.broadcast %6 : f32 to vector<128xf32>
      %138 = arith.addf %136, %137 : vector<128xf32>
      %c5_36 = arith.constant 5 : index
      %c0_37 = arith.constant 0 : index
      %139 = vector.load %arg3[%c5_36, %c0_37] : memref<8x128xf32, #tpu.memory_space<vmem>>, vector<1x128xf32>
      %140 = vector.shape_cast %139 : vector<1x128xf32> to vector<128xf32>
      %c5_38 = arith.constant 5 : index
      %c0_39 = arith.constant 0 : index
      %141 = vector.load %arg4[%c5_38, %c0_39] : memref<8x128xf32, #tpu.memory_space<vmem>>, vector<1x128xf32>
      %142 = vector.shape_cast %141 : vector<1x128xf32> to vector<128xf32>
      %cst_40 = arith.constant 1.000000e+00 : f32
      %143 = vector.broadcast %cst_40 : f32 to vector<128xf32>
      %144 = arith.addf %143, %142 : vector<128xf32>
      %145 = arith.mulf %138, %144 : vector<128xf32>
      %146 = arith.mulf %138, %142 : vector<128xf32>
      %cst_41 = arith.constant 1.000000e+00 : f32
      %147 = vector.broadcast %cst_41 : f32 to vector<128xf32>
      %148 = arith.addf %147, %146 : vector<128xf32>
      %149 = tpu.reciprocal %148 : vector<128xf32> -> vector<128xf32>
      %150 = arith.mulf %145, %149 : vector<128xf32>
      %151 = vector.broadcast %0 : f32 to vector<128xf32>
      %152 = arith.mulf %151, %140 : vector<128xf32>
      %153 = vector.broadcast %1 : f32 to vector<128xf32>
      %154 = arith.mulf %153, %150 : vector<128xf32>
      %155 = arith.addf %152, %154 : vector<128xf32>
      %156 = vector.broadcast %4 : f32 to vector<128xf32>
      %157 = arith.subf %155, %156 : vector<128xf32>
      %cst_42 = arith.constant 0.000000e+00 : f32
      %158 = vector.broadcast %cst_42 : f32 to vector<128xf32>
      %159 = arith.maximumf %157, %158 : vector<128xf32>
      %160 = vector.broadcast %2 : f32 to vector<128xf32>
      %161 = arith.mulf %160, %159 : vector<128xf32>
      %162 = vector.broadcast %5 : f32 to vector<128xf32>
      %163 = arith.addf %161, %162 : vector<128xf32>
      %cst_43 = arith.constant 0.000000e+00 : f32
      %164 = vector.broadcast %cst_43 : f32 to vector<128xf32>
      %165 = arith.maximumf %163, %164 : vector<128xf32>
      %166 = vector.broadcast %3 : f32 to vector<128xf32>
      %167 = arith.mulf %166, %165 : vector<128xf32>
      %168 = vector.broadcast %6 : f32 to vector<128xf32>
      %169 = arith.addf %167, %168 : vector<128xf32>
      %c6_44 = arith.constant 6 : index
      %c0_45 = arith.constant 0 : index
      %170 = vector.load %arg3[%c6_44, %c0_45] : memref<8x128xf32, #tpu.memory_space<vmem>>, vector<1x128xf32>
      %171 = vector.shape_cast %170 : vector<1x128xf32> to vector<128xf32>
      %c6_46 = arith.constant 6 : index
      %c0_47 = arith.constant 0 : index
      %172 = vector.load %arg4[%c6_46, %c0_47] : memref<8x128xf32, #tpu.memory_space<vmem>>, vector<1x128xf32>
      %173 = vector.shape_cast %172 : vector<1x128xf32> to vector<128xf32>
      %cst_48 = arith.constant 1.000000e+00 : f32
      %174 = vector.broadcast %cst_48 : f32 to vector<128xf32>
      %175 = arith.addf %174, %173 : vector<128xf32>
      %176 = arith.mulf %169, %175 : vector<128xf32>
      %177 = arith.mulf %169, %173 : vector<128xf32>
      %cst_49 = arith.constant 1.000000e+00 : f32
      %178 = vector.broadcast %cst_49 : f32 to vector<128xf32>
      %179 = arith.addf %178, %177 : vector<128xf32>
      %180 = tpu.reciprocal %179 : vector<128xf32> -> vector<128xf32>
      %181 = arith.mulf %176, %180 : vector<128xf32>
      %182 = vector.broadcast %0 : f32 to vector<128xf32>
      %183 = arith.mulf %182, %171 : vector<128xf32>
      %184 = vector.broadcast %1 : f32 to vector<128xf32>
      %185 = arith.mulf %184, %181 : vector<128xf32>
      %186 = arith.addf %183, %185 : vector<128xf32>
      %187 = vector.broadcast %4 : f32 to vector<128xf32>
      %188 = arith.subf %186, %187 : vector<128xf32>
      %cst_50 = arith.constant 0.000000e+00 : f32
      %189 = vector.broadcast %cst_50 : f32 to vector<128xf32>
      %190 = arith.maximumf %188, %189 : vector<128xf32>
      %191 = vector.broadcast %2 : f32 to vector<128xf32>
      %192 = arith.mulf %191, %190 : vector<128xf32>
      %193 = vector.broadcast %5 : f32 to vector<128xf32>
      %194 = arith.addf %192, %193 : vector<128xf32>
      %cst_51 = arith.constant 0.000000e+00 : f32
      %195 = vector.broadcast %cst_51 : f32 to vector<128xf32>
      %196 = arith.maximumf %194, %195 : vector<128xf32>
      %197 = vector.broadcast %3 : f32 to vector<128xf32>
      %198 = arith.mulf %197, %196 : vector<128xf32>
      %199 = vector.broadcast %6 : f32 to vector<128xf32>
      %200 = arith.addf %198, %199 : vector<128xf32>
      %c7 = arith.constant 7 : index
      %c0_52 = arith.constant 0 : index
      %201 = vector.load %arg3[%c7, %c0_52] : memref<8x128xf32, #tpu.memory_space<vmem>>, vector<1x128xf32>
      %202 = vector.shape_cast %201 : vector<1x128xf32> to vector<128xf32>
      %c7_53 = arith.constant 7 : index
      %c0_54 = arith.constant 0 : index
      %203 = vector.load %arg4[%c7_53, %c0_54] : memref<8x128xf32, #tpu.memory_space<vmem>>, vector<1x128xf32>
      %204 = vector.shape_cast %203 : vector<1x128xf32> to vector<128xf32>
      %cst_55 = arith.constant 1.000000e+00 : f32
      %205 = vector.broadcast %cst_55 : f32 to vector<128xf32>
      %206 = arith.addf %205, %204 : vector<128xf32>
      %207 = arith.mulf %200, %206 : vector<128xf32>
      %208 = arith.mulf %200, %204 : vector<128xf32>
      %cst_56 = arith.constant 1.000000e+00 : f32
      %209 = vector.broadcast %cst_56 : f32 to vector<128xf32>
      %210 = arith.addf %209, %208 : vector<128xf32>
      %211 = tpu.reciprocal %210 : vector<128xf32> -> vector<128xf32>
      %212 = arith.mulf %207, %211 : vector<128xf32>
      %213 = vector.broadcast %0 : f32 to vector<128xf32>
      %214 = arith.mulf %213, %202 : vector<128xf32>
      %215 = vector.broadcast %1 : f32 to vector<128xf32>
      %216 = arith.mulf %215, %212 : vector<128xf32>
      %217 = arith.addf %214, %216 : vector<128xf32>
      %218 = vector.broadcast %4 : f32 to vector<128xf32>
      %219 = arith.subf %217, %218 : vector<128xf32>
      %cst_57 = arith.constant 0.000000e+00 : f32
      %220 = vector.broadcast %cst_57 : f32 to vector<128xf32>
      %221 = arith.maximumf %219, %220 : vector<128xf32>
      %222 = vector.broadcast %2 : f32 to vector<128xf32>
      %223 = arith.mulf %222, %221 : vector<128xf32>
      %224 = vector.broadcast %5 : f32 to vector<128xf32>
      %225 = arith.addf %223, %224 : vector<128xf32>
      %cst_58 = arith.constant 0.000000e+00 : f32
      %226 = vector.broadcast %cst_58 : f32 to vector<128xf32>
      %227 = arith.maximumf %225, %226 : vector<128xf32>
      %228 = vector.broadcast %3 : f32 to vector<128xf32>
      %229 = arith.mulf %228, %227 : vector<128xf32>
      %230 = vector.broadcast %6 : f32 to vector<128xf32>
      %231 = arith.addf %229, %230 : vector<128xf32>
      %232 = vector.shape_cast %14 : vector<128xf32> to vector<1x128xf32>
      %233 = vector.shape_cast %45 : vector<128xf32> to vector<1x128xf32>
      %234 = vector.shape_cast %76 : vector<128xf32> to vector<1x128xf32>
      %235 = vector.shape_cast %107 : vector<128xf32> to vector<1x128xf32>
      %236 = vector.shape_cast %138 : vector<128xf32> to vector<1x128xf32>
      %237 = vector.shape_cast %169 : vector<128xf32> to vector<1x128xf32>
      %238 = vector.shape_cast %200 : vector<128xf32> to vector<1x128xf32>
      %239 = vector.shape_cast %231 : vector<128xf32> to vector<1x128xf32>
      %240 = tpu.concatenate %232, %233, %234, %235, %236, %237, %238, %239 in 0 : vector<1x128xf32>, vector<1x128xf32>, vector<1x128xf32>, vector<1x128xf32>, vector<1x128xf32>, vector<1x128xf32>, vector<1x128xf32>, vector<1x128xf32> -> vector<8x128xf32>
      %c0_59 = arith.constant 0 : index
      %c0_60 = arith.constant 0 : index
      %241 = vector.load %arg5[%c0_59, %c0_60] : memref<8x128xf32, #tpu.memory_space<vmem>>, vector<8x128xf32>
      tpu.vector_store %arg5[%c0_59, %c0_60], %240 {strides = array<i32>} : memref<8x128xf32, #tpu.memory_space<vmem>>, vector<8x128xf32>,
      %c1_i32 = arith.constant 1 : i32
      %c0_i32_61 = arith.constant 0 : i32
      %242 = arith.addi %c1_i32, %c0_i32_61 : i32
      %c1_i32_62 = arith.constant 1 : i32
      %243 = scf.for %arg7 = %c1_i32 to %242 step %c1_i32_62 iter_args(%arg8 = %231) -> (vector<128xf32>)  : i32 {
        %c8_i32 = arith.constant 8 : i32
        %247 = arith.muli %arg7, %c8_i32 : i32
        %248 = tpu.assume_multiple %247, 8 : i32
        %c0_i32_66 = arith.constant 0 : i32
        %249 = arith.addi %248, %c0_i32_66 : i32
        %250 = arith.index_cast %249 : i32 to index
        %c0_67 = arith.constant 0 : index
        %251 = vector.load %arg3[%250, %c0_67] : memref<8x128xf32, #tpu.memory_space<vmem>>, vector<1x128xf32>
        %252 = vector.shape_cast %251 : vector<1x128xf32> to vector<128xf32>
        %c0_i32_68 = arith.constant 0 : i32
        %253 = arith.addi %248, %c0_i32_68 : i32
        %254 = arith.index_cast %253 : i32 to index
        %c0_69 = arith.constant 0 : index
        %255 = vector.load %arg4[%254, %c0_69] : memref<8x128xf32, #tpu.memory_space<vmem>>, vector<1x128xf32>
        %256 = vector.shape_cast %255 : vector<1x128xf32> to vector<128xf32>
        %cst_70 = arith.constant 1.000000e+00 : f32
        %257 = vector.broadcast %cst_70 : f32 to vector<128xf32>
        %258 = arith.addf %257, %256 : vector<128xf32>
        %259 = arith.mulf %arg8, %258 : vector<128xf32>
        %260 = arith.mulf %arg8, %256 : vector<128xf32>
        %cst_71 = arith.constant 1.000000e+00 : f32
        %261 = vector.broadcast %cst_71 : f32 to vector<128xf32>
        %262 = arith.addf %261, %260 : vector<128xf32>
        %263 = tpu.reciprocal %262 : vector<128xf32> -> vector<128xf32>
        %264 = arith.mulf %259, %263 : vector<128xf32>
        %265 = vector.broadcast %0 : f32 to vector<128xf32>
        %266 = arith.mulf %265, %252 : vector<128xf32>
        %267 = vector.broadcast %1 : f32 to vector<128xf32>
        %268 = arith.mulf %267, %264 : vector<128xf32>
        %269 = arith.addf %266, %268 : vector<128xf32>
        %270 = vector.broadcast %4 : f32 to vector<128xf32>
        %271 = arith.subf %269, %270 : vector<128xf32>
        %cst_72 = arith.constant 0.000000e+00 : f32
        %272 = vector.broadcast %cst_72 : f32 to vector<128xf32>
        %273 = arith.maximumf %271, %272 : vector<128xf32>
        %274 = vector.broadcast %2 : f32 to vector<128xf32>
        %275 = arith.mulf %274, %273 : vector<128xf32>
        %276 = vector.broadcast %5 : f32 to vector<128xf32>
        %277 = arith.addf %275, %276 : vector<128xf32>
        %cst_73 = arith.constant 0.000000e+00 : f32
        %278 = vector.broadcast %cst_73 : f32 to vector<128xf32>
        %279 = arith.maximumf %277, %278 : vector<128xf32>
        %280 = vector.broadcast %3 : f32 to vector<128xf32>
        %281 = arith.mulf %280, %279 : vector<128xf32>
        %282 = vector.broadcast %6 : f32 to vector<128xf32>
        %283 = arith.addf %281, %282 : vector<128xf32>
        %c1_i32_74 = arith.constant 1 : i32
        %284 = arith.addi %248, %c1_i32_74 : i32
        %285 = arith.index_cast %284 : i32 to index
        %c0_75 = arith.constant 0 : index
        %286 = vector.load %arg3[%285, %c0_75] : memref<8x128xf32, #tpu.memory_space<vmem>>, vector<1x128xf32>
        %287 = vector.shape_cast %286 : vector<1x128xf32> to vector<128xf32>
        %c1_i32_76 = arith.constant 1 : i32
        %288 = arith.addi %248, %c1_i32_76 : i32
        %289 = arith.index_cast %288 : i32 to index
        %c0_77 = arith.constant 0 : index
        %290 = vector.load %arg4[%289, %c0_77] : memref<8x128xf32, #tpu.memory_space<vmem>>, vector<1x128xf32>
        %291 = vector.shape_cast %290 : vector<1x128xf32> to vector<128xf32>
        %cst_78 = arith.constant 1.000000e+00 : f32
        %292 = vector.broadcast %cst_78 : f32 to vector<128xf32>
        %293 = arith.addf %292, %291 : vector<128xf32>
        %294 = arith.mulf %283, %293 : vector<128xf32>
        %295 = arith.mulf %283, %291 : vector<128xf32>
        %cst_79 = arith.constant 1.000000e+00 : f32
        %296 = vector.broadcast %cst_79 : f32 to vector<128xf32>
        %297 = arith.addf %296, %295 : vector<128xf32>
        %298 = tpu.reciprocal %297 : vector<128xf32> -> vector<128xf32>
        %299 = arith.mulf %294, %298 : vector<128xf32>
        %300 = vector.broadcast %0 : f32 to vector<128xf32>
        %301 = arith.mulf %300, %287 : vector<128xf32>
        %302 = vector.broadcast %1 : f32 to vector<128xf32>
        %303 = arith.mulf %302, %299 : vector<128xf32>
        %304 = arith.addf %301, %303 : vector<128xf32>
        %305 = vector.broadcast %4 : f32 to vector<128xf32>
        %306 = arith.subf %304, %305 : vector<128xf32>
        %cst_80 = arith.constant 0.000000e+00 : f32
        %307 = vector.broadcast %cst_80 : f32 to vector<128xf32>
        %308 = arith.maximumf %306, %307 : vector<128xf32>
        %309 = vector.broadcast %2 : f32 to vector<128xf32>
        %310 = arith.mulf %309, %308 : vector<128xf32>
        %311 = vector.broadcast %5 : f32 to vector<128xf32>
        %312 = arith.addf %310, %311 : vector<128xf32>
        %cst_81 = arith.constant 0.000000e+00 : f32
        %313 = vector.broadcast %cst_81 : f32 to vector<128xf32>
        %314 = arith.maximumf %312, %313 : vector<128xf32>
        %315 = vector.broadcast %3 : f32 to vector<128xf32>
        %316 = arith.mulf %315, %314 : vector<128xf32>
        %317 = vector.broadcast %6 : f32 to vector<128xf32>
        %318 = arith.addf %316, %317 : vector<128xf32>
        %c2_i32 = arith.constant 2 : i32
        %319 = arith.addi %248, %c2_i32 : i32
        %320 = arith.index_cast %319 : i32 to index
        %c0_82 = arith.constant 0 : index
        %321 = vector.load %arg3[%320, %c0_82] : memref<8x128xf32, #tpu.memory_space<vmem>>, vector<1x128xf32>
        %322 = vector.shape_cast %321 : vector<1x128xf32> to vector<128xf32>
        %c2_i32_83 = arith.constant 2 : i32
        %323 = arith.addi %248, %c2_i32_83 : i32
        %324 = arith.index_cast %323 : i32 to index
        %c0_84 = arith.constant 0 : index
        %325 = vector.load %arg4[%324, %c0_84] : memref<8x128xf32, #tpu.memory_space<vmem>>, vector<1x128xf32>
        %326 = vector.shape_cast %325 : vector<1x128xf32> to vector<128xf32>
        %cst_85 = arith.constant 1.000000e+00 : f32
        %327 = vector.broadcast %cst_85 : f32 to vector<128xf32>
        %328 = arith.addf %327, %326 : vector<128xf32>
        %329 = arith.mulf %318, %328 : vector<128xf32>
        %330 = arith.mulf %318, %326 : vector<128xf32>
        %cst_86 = arith.constant 1.000000e+00 : f32
        %331 = vector.broadcast %cst_86 : f32 to vector<128xf32>
        %332 = arith.addf %331, %330 : vector<128xf32>
        %333 = tpu.reciprocal %332 : vector<128xf32> -> vector<128xf32>
        %334 = arith.mulf %329, %333 : vector<128xf32>
        %335 = vector.broadcast %0 : f32 to vector<128xf32>
        %336 = arith.mulf %335, %322 : vector<128xf32>
        %337 = vector.broadcast %1 : f32 to vector<128xf32>
        %338 = arith.mulf %337, %334 : vector<128xf32>
        %339 = arith.addf %336, %338 : vector<128xf32>
        %340 = vector.broadcast %4 : f32 to vector<128xf32>
        %341 = arith.subf %339, %340 : vector<128xf32>
        %cst_87 = arith.constant 0.000000e+00 : f32
        %342 = vector.broadcast %cst_87 : f32 to vector<128xf32>
        %343 = arith.maximumf %341, %342 : vector<128xf32>
        %344 = vector.broadcast %2 : f32 to vector<128xf32>
        %345 = arith.mulf %344, %343 : vector<128xf32>
        %346 = vector.broadcast %5 : f32 to vector<128xf32>
        %347 = arith.addf %345, %346 : vector<128xf32>
        %cst_88 = arith.constant 0.000000e+00 : f32
        %348 = vector.broadcast %cst_88 : f32 to vector<128xf32>
        %349 = arith.maximumf %347, %348 : vector<128xf32>
        %350 = vector.broadcast %3 : f32 to vector<128xf32>
        %351 = arith.mulf %350, %349 : vector<128xf32>
        %352 = vector.broadcast %6 : f32 to vector<128xf32>
        %353 = arith.addf %351, %352 : vector<128xf32>
        %c3_i32 = arith.constant 3 : i32
        %354 = arith.addi %248, %c3_i32 : i32
        %355 = arith.index_cast %354 : i32 to index
        %c0_89 = arith.constant 0 : index
        %356 = vector.load %arg3[%355, %c0_89] : memref<8x128xf32, #tpu.memory_space<vmem>>, vector<1x128xf32>
        %357 = vector.shape_cast %356 : vector<1x128xf32> to vector<128xf32>
        %c3_i32_90 = arith.constant 3 : i32
        %358 = arith.addi %248, %c3_i32_90 : i32
        %359 = arith.index_cast %358 : i32 to index
        %c0_91 = arith.constant 0 : index
        %360 = vector.load %arg4[%359, %c0_91] : memref<8x128xf32, #tpu.memory_space<vmem>>, vector<1x128xf32>
        %361 = vector.shape_cast %360 : vector<1x128xf32> to vector<128xf32>
        %cst_92 = arith.constant 1.000000e+00 : f32
        %362 = vector.broadcast %cst_92 : f32 to vector<128xf32>
        %363 = arith.addf %362, %361 : vector<128xf32>
        %364 = arith.mulf %353, %363 : vector<128xf32>
        %365 = arith.mulf %353, %361 : vector<128xf32>
        %cst_93 = arith.constant 1.000000e+00 : f32
        %366 = vector.broadcast %cst_93 : f32 to vector<128xf32>
        %367 = arith.addf %366, %365 : vector<128xf32>
        %368 = tpu.reciprocal %367 : vector<128xf32> -> vector<128xf32>
        %369 = arith.mulf %364, %368 : vector<128xf32>
        %370 = vector.broadcast %0 : f32 to vector<128xf32>
        %371 = arith.mulf %370, %357 : vector<128xf32>
        %372 = vector.broadcast %1 : f32 to vector<128xf32>
        %373 = arith.mulf %372, %369 : vector<128xf32>
        %374 = arith.addf %371, %373 : vector<128xf32>
        %375 = vector.broadcast %4 : f32 to vector<128xf32>
        %376 = arith.subf %374, %375 : vector<128xf32>
        %cst_94 = arith.constant 0.000000e+00 : f32
        %377 = vector.broadcast %cst_94 : f32 to vector<128xf32>
        %378 = arith.maximumf %376, %377 : vector<128xf32>
        %379 = vector.broadcast %2 : f32 to vector<128xf32>
        %380 = arith.mulf %379, %378 : vector<128xf32>
        %381 = vector.broadcast %5 : f32 to vector<128xf32>
        %382 = arith.addf %380, %381 : vector<128xf32>
        %cst_95 = arith.constant 0.000000e+00 : f32
        %383 = vector.broadcast %cst_95 : f32 to vector<128xf32>
        %384 = arith.maximumf %382, %383 : vector<128xf32>
        %385 = vector.broadcast %3 : f32 to vector<128xf32>
        %386 = arith.mulf %385, %384 : vector<128xf32>
        %387 = vector.broadcast %6 : f32 to vector<128xf32>
        %388 = arith.addf %386, %387 : vector<128xf32>
        %c4_i32 = arith.constant 4 : i32
        %389 = arith.addi %248, %c4_i32 : i32
        %390 = arith.index_cast %389 : i32 to index
        %c0_96 = arith.constant 0 : index
        %391 = vector.load %arg3[%390, %c0_96] : memref<8x128xf32, #tpu.memory_space<vmem>>, vector<1x128xf32>
        %392 = vector.shape_cast %391 : vector<1x128xf32> to vector<128xf32>
        %c4_i32_97 = arith.constant 4 : i32
        %393 = arith.addi %248, %c4_i32_97 : i32
        %394 = arith.index_cast %393 : i32 to index
        %c0_98 = arith.constant 0 : index
        %395 = vector.load %arg4[%394, %c0_98] : memref<8x128xf32, #tpu.memory_space<vmem>>, vector<1x128xf32>
        %396 = vector.shape_cast %395 : vector<1x128xf32> to vector<128xf32>
        %cst_99 = arith.constant 1.000000e+00 : f32
        %397 = vector.broadcast %cst_99 : f32 to vector<128xf32>
        %398 = arith.addf %397, %396 : vector<128xf32>
        %399 = arith.mulf %388, %398 : vector<128xf32>
        %400 = arith.mulf %388, %396 : vector<128xf32>
        %cst_100 = arith.constant 1.000000e+00 : f32
        %401 = vector.broadcast %cst_100 : f32 to vector<128xf32>
        %402 = arith.addf %401, %400 : vector<128xf32>
        %403 = tpu.reciprocal %402 : vector<128xf32> -> vector<128xf32>
        %404 = arith.mulf %399, %403 : vector<128xf32>
        %405 = vector.broadcast %0 : f32 to vector<128xf32>
        %406 = arith.mulf %405, %392 : vector<128xf32>
        %407 = vector.broadcast %1 : f32 to vector<128xf32>
        %408 = arith.mulf %407, %404 : vector<128xf32>
        %409 = arith.addf %406, %408 : vector<128xf32>
        %410 = vector.broadcast %4 : f32 to vector<128xf32>
        %411 = arith.subf %409, %410 : vector<128xf32>
        %cst_101 = arith.constant 0.000000e+00 : f32
        %412 = vector.broadcast %cst_101 : f32 to vector<128xf32>
        %413 = arith.maximumf %411, %412 : vector<128xf32>
        %414 = vector.broadcast %2 : f32 to vector<128xf32>
        %415 = arith.mulf %414, %413 : vector<128xf32>
        %416 = vector.broadcast %5 : f32 to vector<128xf32>
        %417 = arith.addf %415, %416 : vector<128xf32>
        %cst_102 = arith.constant 0.000000e+00 : f32
        %418 = vector.broadcast %cst_102 : f32 to vector<128xf32>
        %419 = arith.maximumf %417, %418 : vector<128xf32>
        %420 = vector.broadcast %3 : f32 to vector<128xf32>
        %421 = arith.mulf %420, %419 : vector<128xf32>
        %422 = vector.broadcast %6 : f32 to vector<128xf32>
        %423 = arith.addf %421, %422 : vector<128xf32>
        %c5_i32 = arith.constant 5 : i32
        %424 = arith.addi %248, %c5_i32 : i32
        %425 = arith.index_cast %424 : i32 to index
        %c0_103 = arith.constant 0 : index
        %426 = vector.load %arg3[%425, %c0_103] : memref<8x128xf32, #tpu.memory_space<vmem>>, vector<1x128xf32>
        %427 = vector.shape_cast %426 : vector<1x128xf32> to vector<128xf32>
        %c5_i32_104 = arith.constant 5 : i32
        %428 = arith.addi %248, %c5_i32_104 : i32
        %429 = arith.index_cast %428 : i32 to index
        %c0_105 = arith.constant 0 : index
        %430 = vector.load %arg4[%429, %c0_105] : memref<8x128xf32, #tpu.memory_space<vmem>>, vector<1x128xf32>
        %431 = vector.shape_cast %430 : vector<1x128xf32> to vector<128xf32>
        %cst_106 = arith.constant 1.000000e+00 : f32
        %432 = vector.broadcast %cst_106 : f32 to vector<128xf32>
        %433 = arith.addf %432, %431 : vector<128xf32>
        %434 = arith.mulf %423, %433 : vector<128xf32>
        %435 = arith.mulf %423, %431 : vector<128xf32>
        %cst_107 = arith.constant 1.000000e+00 : f32
        %436 = vector.broadcast %cst_107 : f32 to vector<128xf32>
        %437 = arith.addf %436, %435 : vector<128xf32>
        %438 = tpu.reciprocal %437 : vector<128xf32> -> vector<128xf32>
        %439 = arith.mulf %434, %438 : vector<128xf32>
        %440 = vector.broadcast %0 : f32 to vector<128xf32>
        %441 = arith.mulf %440, %427 : vector<128xf32>
        %442 = vector.broadcast %1 : f32 to vector<128xf32>
        %443 = arith.mulf %442, %439 : vector<128xf32>
        %444 = arith.addf %441, %443 : vector<128xf32>
        %445 = vector.broadcast %4 : f32 to vector<128xf32>
        %446 = arith.subf %444, %445 : vector<128xf32>
        %cst_108 = arith.constant 0.000000e+00 : f32
        %447 = vector.broadcast %cst_108 : f32 to vector<128xf32>
        %448 = arith.maximumf %446, %447 : vector<128xf32>
        %449 = vector.broadcast %2 : f32 to vector<128xf32>
        %450 = arith.mulf %449, %448 : vector<128xf32>
        %451 = vector.broadcast %5 : f32 to vector<128xf32>
        %452 = arith.addf %450, %451 : vector<128xf32>
        %cst_109 = arith.constant 0.000000e+00 : f32
        %453 = vector.broadcast %cst_109 : f32 to vector<128xf32>
        %454 = arith.maximumf %452, %453 : vector<128xf32>
        %455 = vector.broadcast %3 : f32 to vector<128xf32>
        %456 = arith.mulf %455, %454 : vector<128xf32>
        %457 = vector.broadcast %6 : f32 to vector<128xf32>
        %458 = arith.addf %456, %457 : vector<128xf32>
        %c6_i32 = arith.constant 6 : i32
        %459 = arith.addi %248, %c6_i32 : i32
        %460 = arith.index_cast %459 : i32 to index
        %c0_110 = arith.constant 0 : index
        %461 = vector.load %arg3[%460, %c0_110] : memref<8x128xf32, #tpu.memory_space<vmem>>, vector<1x128xf32>
        %462 = vector.shape_cast %461 : vector<1x128xf32> to vector<128xf32>
        %c6_i32_111 = arith.constant 6 : i32
        %463 = arith.addi %248, %c6_i32_111 : i32
        %464 = arith.index_cast %463 : i32 to index
        %c0_112 = arith.constant 0 : index
        %465 = vector.load %arg4[%464, %c0_112] : memref<8x128xf32, #tpu.memory_space<vmem>>, vector<1x128xf32>
        %466 = vector.shape_cast %465 : vector<1x128xf32> to vector<128xf32>
        %cst_113 = arith.constant 1.000000e+00 : f32
        %467 = vector.broadcast %cst_113 : f32 to vector<128xf32>
        %468 = arith.addf %467, %466 : vector<128xf32>
        %469 = arith.mulf %458, %468 : vector<128xf32>
        %470 = arith.mulf %458, %466 : vector<128xf32>
        %cst_114 = arith.constant 1.000000e+00 : f32
        %471 = vector.broadcast %cst_114 : f32 to vector<128xf32>
        %472 = arith.addf %471, %470 : vector<128xf32>
        %473 = tpu.reciprocal %472 : vector<128xf32> -> vector<128xf32>
        %474 = arith.mulf %469, %473 : vector<128xf32>
        %475 = vector.broadcast %0 : f32 to vector<128xf32>
        %476 = arith.mulf %475, %462 : vector<128xf32>
        %477 = vector.broadcast %1 : f32 to vector<128xf32>
        %478 = arith.mulf %477, %474 : vector<128xf32>
        %479 = arith.addf %476, %478 : vector<128xf32>
        %480 = vector.broadcast %4 : f32 to vector<128xf32>
        %481 = arith.subf %479, %480 : vector<128xf32>
        %cst_115 = arith.constant 0.000000e+00 : f32
        %482 = vector.broadcast %cst_115 : f32 to vector<128xf32>
        %483 = arith.maximumf %481, %482 : vector<128xf32>
        %484 = vector.broadcast %2 : f32 to vector<128xf32>
        %485 = arith.mulf %484, %483 : vector<128xf32>
        %486 = vector.broadcast %5 : f32 to vector<128xf32>
        %487 = arith.addf %485, %486 : vector<128xf32>
        %cst_116 = arith.constant 0.000000e+00 : f32
        %488 = vector.broadcast %cst_116 : f32 to vector<128xf32>
        %489 = arith.maximumf %487, %488 : vector<128xf32>
        %490 = vector.broadcast %3 : f32 to vector<128xf32>
        %491 = arith.mulf %490, %489 : vector<128xf32>
        %492 = vector.broadcast %6 : f32 to vector<128xf32>
        %493 = arith.addf %491, %492 : vector<128xf32>
        %c7_i32 = arith.constant 7 : i32
        %494 = arith.addi %248, %c7_i32 : i32
        %495 = arith.index_cast %494 : i32 to index
        %c0_117 = arith.constant 0 : index
        %496 = vector.load %arg3[%495, %c0_117] : memref<8x128xf32, #tpu.memory_space<vmem>>, vector<1x128xf32>
        %497 = vector.shape_cast %496 : vector<1x128xf32> to vector<128xf32>
        %c7_i32_118 = arith.constant 7 : i32
        %498 = arith.addi %248, %c7_i32_118 : i32
        %499 = arith.index_cast %498 : i32 to index
        %c0_119 = arith.constant 0 : index
        %500 = vector.load %arg4[%499, %c0_119] : memref<8x128xf32, #tpu.memory_space<vmem>>, vector<1x128xf32>
        %501 = vector.shape_cast %500 : vector<1x128xf32> to vector<128xf32>
        %cst_120 = arith.constant 1.000000e+00 : f32
        %502 = vector.broadcast %cst_120 : f32 to vector<128xf32>
        %503 = arith.addf %502, %501 : vector<128xf32>
        %504 = arith.mulf %493, %503 : vector<128xf32>
        %505 = arith.mulf %493, %501 : vector<128xf32>
        %cst_121 = arith.constant 1.000000e+00 : f32
        %506 = vector.broadcast %cst_121 : f32 to vector<128xf32>
        %507 = arith.addf %506, %505 : vector<128xf32>
        %508 = tpu.reciprocal %507 : vector<128xf32> -> vector<128xf32>
        %509 = arith.mulf %504, %508 : vector<128xf32>
        %510 = vector.broadcast %0 : f32 to vector<128xf32>
        %511 = arith.mulf %510, %497 : vector<128xf32>
        %512 = vector.broadcast %1 : f32 to vector<128xf32>
        %513 = arith.mulf %512, %509 : vector<128xf32>
        %514 = arith.addf %511, %513 : vector<128xf32>
        %515 = vector.broadcast %4 : f32 to vector<128xf32>
        %516 = arith.subf %514, %515 : vector<128xf32>
        %cst_122 = arith.constant 0.000000e+00 : f32
        %517 = vector.broadcast %cst_122 : f32 to vector<128xf32>
        %518 = arith.maximumf %516, %517 : vector<128xf32>
        %519 = vector.broadcast %2 : f32 to vector<128xf32>
        %520 = arith.mulf %519, %518 : vector<128xf32>
        %521 = vector.broadcast %5 : f32 to vector<128xf32>
        %522 = arith.addf %520, %521 : vector<128xf32>
        %cst_123 = arith.constant 0.000000e+00 : f32
        %523 = vector.broadcast %cst_123 : f32 to vector<128xf32>
        %524 = arith.maximumf %522, %523 : vector<128xf32>
        %525 = vector.broadcast %3 : f32 to vector<128xf32>
        %526 = arith.mulf %525, %524 : vector<128xf32>
        %527 = vector.broadcast %6 : f32 to vector<128xf32>
        %528 = arith.addf %526, %527 : vector<128xf32>
        %529 = vector.shape_cast %283 : vector<128xf32> to vector<1x128xf32>
        %530 = vector.shape_cast %318 : vector<128xf32> to vector<1x128xf32>
        %531 = vector.shape_cast %353 : vector<128xf32> to vector<1x128xf32>
        %532 = vector.shape_cast %388 : vector<128xf32> to vector<1x128xf32>
        %533 = vector.shape_cast %423 : vector<128xf32> to vector<1x128xf32>
        %534 = vector.shape_cast %458 : vector<128xf32> to vector<1x128xf32>
        %535 = vector.shape_cast %493 : vector<128xf32> to vector<1x128xf32>
        %536 = vector.shape_cast %528 : vector<128xf32> to vector<1x128xf32>
        %537 = tpu.concatenate %529, %530, %531, %532, %533, %534, %535, %536 in 0 : vector<1x128xf32>, vector<1x128xf32>, vector<1x128xf32>, vector<1x128xf32>, vector<1x128xf32>, vector<1x128xf32>, vector<1x128xf32>, vector<1x128xf32> -> vector<8x128xf32>
        %538 = arith.index_cast %248 : i32 to index
        %c0_124 = arith.constant 0 : index
        %539 = vector.load %arg5[%538, %c0_124] : memref<8x128xf32, #tpu.memory_space<vmem>>, vector<8x128xf32>
        tpu.vector_store %arg5[%538, %c0_124], %537 {strides = array<i32>} : memref<8x128xf32, #tpu.memory_space<vmem>>, vector<8x128xf32>,
        scf.yield %528 : vector<128xf32>
      }
      %c0_i32_63 = arith.constant 0 : i32
      %c0_64 = arith.constant 0 : index
      %c0_65 = arith.constant 0 : index
      %244 = vector.load %arg6[%c0_64, %c0_65] : memref<1x128xf32, #tpu.memory_space<vmem>>, vector<1x128xf32>
      %245 = vector.shape_cast %244 : vector<1x128xf32> to vector<128xf32>
      %246 = vector.shape_cast %243 : vector<128xf32> to vector<1x128xf32>
      tpu.vector_store %arg6[%c0_64, %c0_65], %246 {strides = array<i32>} : memref<1x128xf32, #tpu.memory_space<vmem>>, vector<1x128xf32>,
    } else {
    }
    %c0_i32_1 = arith.constant 0 : i32
    %10 = arith.cmpi ne, %arg1, %c0_i32_1 : i32
    %11 = arith.extui %10 : i1 to i32
    %c0_i32_2 = arith.constant 0 : i32
    %12 = arith.cmpi ne, %11, %c0_i32_2 : i32
    scf.if %12 {
      %c0_3 = arith.constant 0 : index
      %c0_4 = arith.constant 0 : index
      %13 = vector.load %arg6[%c0_3, %c0_4] : memref<1x128xf32, #tpu.memory_space<vmem>>, vector<1x128xf32>
      %14 = vector.shape_cast %13 : vector<1x128xf32> to vector<128xf32>
      %c0_i32_5 = arith.constant 0 : i32
      %c8_i32 = arith.constant 8 : i32
      %15 = arith.muli %c0_i32_5, %c8_i32 : i32
      %16 = tpu.assume_multiple %15, 8 : i32
      %c0_i32_6 = arith.constant 0 : i32
      %17 = arith.addi %16, %c0_i32_6 : i32
      %18 = arith.index_cast %17 : i32 to index
      %c0_7 = arith.constant 0 : index
      %19 = vector.load %arg3[%18, %c0_7] : memref<8x128xf32, #tpu.memory_space<vmem>>, vector<1x128xf32>
      %20 = vector.shape_cast %19 : vector<1x128xf32> to vector<128xf32>
      %c0_i32_8 = arith.constant 0 : i32
      %21 = arith.addi %16, %c0_i32_8 : i32
      %22 = arith.index_cast %21 : i32 to index
      %c0_9 = arith.constant 0 : index
      %23 = vector.load %arg4[%22, %c0_9] : memref<8x128xf32, #tpu.memory_space<vmem>>, vector<1x128xf32>
      %24 = vector.shape_cast %23 : vector<1x128xf32> to vector<128xf32>
      %cst = arith.constant 1.000000e+00 : f32
      %25 = vector.broadcast %cst : f32 to vector<128xf32>
      %26 = arith.addf %25, %24 : vector<128xf32>
      %27 = arith.mulf %14, %26 : vector<128xf32>
      %28 = arith.mulf %14, %24 : vector<128xf32>
      %cst_10 = arith.constant 1.000000e+00 : f32
      %29 = vector.broadcast %cst_10 : f32 to vector<128xf32>
      %30 = arith.addf %29, %28 : vector<128xf32>
      %31 = tpu.reciprocal %30 : vector<128xf32> -> vector<128xf32>
      %32 = arith.mulf %27, %31 : vector<128xf32>
      %33 = vector.broadcast %0 : f32 to vector<128xf32>
      %34 = arith.mulf %33, %20 : vector<128xf32>
      %35 = vector.broadcast %1 : f32 to vector<128xf32>
      %36 = arith.mulf %35, %32 : vector<128xf32>
      %37 = arith.addf %34, %36 : vector<128xf32>
      %38 = vector.broadcast %4 : f32 to vector<128xf32>
      %39 = arith.subf %37, %38 : vector<128xf32>
      %cst_11 = arith.constant 0.000000e+00 : f32
      %40 = vector.broadcast %cst_11 : f32 to vector<128xf32>
      %41 = arith.maximumf %39, %40 : vector<128xf32>
      %42 = vector.broadcast %2 : f32 to vector<128xf32>
      %43 = arith.mulf %42, %41 : vector<128xf32>
      %44 = vector.broadcast %5 : f32 to vector<128xf32>
      %45 = arith.addf %43, %44 : vector<128xf32>
      %cst_12 = arith.constant 0.000000e+00 : f32
      %46 = vector.broadcast %cst_12 : f32 to vector<128xf32>
      %47 = arith.maximumf %45, %46 : vector<128xf32>
      %48 = vector.broadcast %3 : f32 to vector<128xf32>
      %49 = arith.mulf %48, %47 : vector<128xf32>
      %50 = vector.broadcast %6 : f32 to vector<128xf32>
      %51 = arith.addf %49, %50 : vector<128xf32>
      %c1_i32 = arith.constant 1 : i32
      %52 = arith.addi %16, %c1_i32 : i32
      %53 = arith.index_cast %52 : i32 to index
      %c0_13 = arith.constant 0 : index
      %54 = vector.load %arg3[%53, %c0_13] : memref<8x128xf32, #tpu.memory_space<vmem>>, vector<1x128xf32>
      %55 = vector.shape_cast %54 : vector<1x128xf32> to vector<128xf32>
      %c1_i32_14 = arith.constant 1 : i32
      %56 = arith.addi %16, %c1_i32_14 : i32
      %57 = arith.index_cast %56 : i32 to index
      %c0_15 = arith.constant 0 : index
      %58 = vector.load %arg4[%57, %c0_15] : memref<8x128xf32, #tpu.memory_space<vmem>>, vector<1x128xf32>
      %59 = vector.shape_cast %58 : vector<1x128xf32> to vector<128xf32>
      %cst_16 = arith.constant 1.000000e+00 : f32
      %60 = vector.broadcast %cst_16 : f32 to vector<128xf32>
      %61 = arith.addf %60, %59 : vector<128xf32>
      %62 = arith.mulf %51, %61 : vector<128xf32>
      %63 = arith.mulf %51, %59 : vector<128xf32>
      %cst_17 = arith.constant 1.000000e+00 : f32
      %64 = vector.broadcast %cst_17 : f32 to vector<128xf32>
      %65 = arith.addf %64, %63 : vector<128xf32>
      %66 = tpu.reciprocal %65 : vector<128xf32> -> vector<128xf32>
      %67 = arith.mulf %62, %66 : vector<128xf32>
      %68 = vector.broadcast %0 : f32 to vector<128xf32>
      %69 = arith.mulf %68, %55 : vector<128xf32>
      %70 = vector.broadcast %1 : f32 to vector<128xf32>
      %71 = arith.mulf %70, %67 : vector<128xf32>
      %72 = arith.addf %69, %71 : vector<128xf32>
      %73 = vector.broadcast %4 : f32 to vector<128xf32>
      %74 = arith.subf %72, %73 : vector<128xf32>
      %cst_18 = arith.constant 0.000000e+00 : f32
      %75 = vector.broadcast %cst_18 : f32 to vector<128xf32>
      %76 = arith.maximumf %74, %75 : vector<128xf32>
      %77 = vector.broadcast %2 : f32 to vector<128xf32>
      %78 = arith.mulf %77, %76 : vector<128xf32>
      %79 = vector.broadcast %5 : f32 to vector<128xf32>
      %80 = arith.addf %78, %79 : vector<128xf32>
      %cst_19 = arith.constant 0.000000e+00 : f32
      %81 = vector.broadcast %cst_19 : f32 to vector<128xf32>
      %82 = arith.maximumf %80, %81 : vector<128xf32>
      %83 = vector.broadcast %3 : f32 to vector<128xf32>
      %84 = arith.mulf %83, %82 : vector<128xf32>
      %85 = vector.broadcast %6 : f32 to vector<128xf32>
      %86 = arith.addf %84, %85 : vector<128xf32>
      %c2_i32 = arith.constant 2 : i32
      %87 = arith.addi %16, %c2_i32 : i32
      %88 = arith.index_cast %87 : i32 to index
      %c0_20 = arith.constant 0 : index
      %89 = vector.load %arg3[%88, %c0_20] : memref<8x128xf32, #tpu.memory_space<vmem>>, vector<1x128xf32>
      %90 = vector.shape_cast %89 : vector<1x128xf32> to vector<128xf32>
      %c2_i32_21 = arith.constant 2 : i32
      %91 = arith.addi %16, %c2_i32_21 : i32
      %92 = arith.index_cast %91 : i32 to index
      %c0_22 = arith.constant 0 : index
      %93 = vector.load %arg4[%92, %c0_22] : memref<8x128xf32, #tpu.memory_space<vmem>>, vector<1x128xf32>
      %94 = vector.shape_cast %93 : vector<1x128xf32> to vector<128xf32>
      %cst_23 = arith.constant 1.000000e+00 : f32
      %95 = vector.broadcast %cst_23 : f32 to vector<128xf32>
      %96 = arith.addf %95, %94 : vector<128xf32>
      %97 = arith.mulf %86, %96 : vector<128xf32>
      %98 = arith.mulf %86, %94 : vector<128xf32>
      %cst_24 = arith.constant 1.000000e+00 : f32
      %99 = vector.broadcast %cst_24 : f32 to vector<128xf32>
      %100 = arith.addf %99, %98 : vector<128xf32>
      %101 = tpu.reciprocal %100 : vector<128xf32> -> vector<128xf32>
      %102 = arith.mulf %97, %101 : vector<128xf32>
      %103 = vector.broadcast %0 : f32 to vector<128xf32>
      %104 = arith.mulf %103, %90 : vector<128xf32>
      %105 = vector.broadcast %1 : f32 to vector<128xf32>
      %106 = arith.mulf %105, %102 : vector<128xf32>
      %107 = arith.addf %104, %106 : vector<128xf32>
      %108 = vector.broadcast %4 : f32 to vector<128xf32>
      %109 = arith.subf %107, %108 : vector<128xf32>
      %cst_25 = arith.constant 0.000000e+00 : f32
      %110 = vector.broadcast %cst_25 : f32 to vector<128xf32>
      %111 = arith.maximumf %109, %110 : vector<128xf32>
      %112 = vector.broadcast %2 : f32 to vector<128xf32>
      %113 = arith.mulf %112, %111 : vector<128xf32>
      %114 = vector.broadcast %5 : f32 to vector<128xf32>
      %115 = arith.addf %113, %114 : vector<128xf32>
      %cst_26 = arith.constant 0.000000e+00 : f32
      %116 = vector.broadcast %cst_26 : f32 to vector<128xf32>
      %117 = arith.maximumf %115, %116 : vector<128xf32>
      %118 = vector.broadcast %3 : f32 to vector<128xf32>
      %119 = arith.mulf %118, %117 : vector<128xf32>
      %120 = vector.broadcast %6 : f32 to vector<128xf32>
      %121 = arith.addf %119, %120 : vector<128xf32>
      %c3_i32 = arith.constant 3 : i32
      %122 = arith.addi %16, %c3_i32 : i32
      %123 = arith.index_cast %122 : i32 to index
      %c0_27 = arith.constant 0 : index
      %124 = vector.load %arg3[%123, %c0_27] : memref<8x128xf32, #tpu.memory_space<vmem>>, vector<1x128xf32>
      %125 = vector.shape_cast %124 : vector<1x128xf32> to vector<128xf32>
      %c3_i32_28 = arith.constant 3 : i32
      %126 = arith.addi %16, %c3_i32_28 : i32
      %127 = arith.index_cast %126 : i32 to index
      %c0_29 = arith.constant 0 : index
      %128 = vector.load %arg4[%127, %c0_29] : memref<8x128xf32, #tpu.memory_space<vmem>>, vector<1x128xf32>
      %129 = vector.shape_cast %128 : vector<1x128xf32> to vector<128xf32>
      %cst_30 = arith.constant 1.000000e+00 : f32
      %130 = vector.broadcast %cst_30 : f32 to vector<128xf32>
      %131 = arith.addf %130, %129 : vector<128xf32>
      %132 = arith.mulf %121, %131 : vector<128xf32>
      %133 = arith.mulf %121, %129 : vector<128xf32>
      %cst_31 = arith.constant 1.000000e+00 : f32
      %134 = vector.broadcast %cst_31 : f32 to vector<128xf32>
      %135 = arith.addf %134, %133 : vector<128xf32>
      %136 = tpu.reciprocal %135 : vector<128xf32> -> vector<128xf32>
      %137 = arith.mulf %132, %136 : vector<128xf32>
      %138 = vector.broadcast %0 : f32 to vector<128xf32>
      %139 = arith.mulf %138, %125 : vector<128xf32>
      %140 = vector.broadcast %1 : f32 to vector<128xf32>
      %141 = arith.mulf %140, %137 : vector<128xf32>
      %142 = arith.addf %139, %141 : vector<128xf32>
      %143 = vector.broadcast %4 : f32 to vector<128xf32>
      %144 = arith.subf %142, %143 : vector<128xf32>
      %cst_32 = arith.constant 0.000000e+00 : f32
      %145 = vector.broadcast %cst_32 : f32 to vector<128xf32>
      %146 = arith.maximumf %144, %145 : vector<128xf32>
      %147 = vector.broadcast %2 : f32 to vector<128xf32>
      %148 = arith.mulf %147, %146 : vector<128xf32>
      %149 = vector.broadcast %5 : f32 to vector<128xf32>
      %150 = arith.addf %148, %149 : vector<128xf32>
      %cst_33 = arith.constant 0.000000e+00 : f32
      %151 = vector.broadcast %cst_33 : f32 to vector<128xf32>
      %152 = arith.maximumf %150, %151 : vector<128xf32>
      %153 = vector.broadcast %3 : f32 to vector<128xf32>
      %154 = arith.mulf %153, %152 : vector<128xf32>
      %155 = vector.broadcast %6 : f32 to vector<128xf32>
      %156 = arith.addf %154, %155 : vector<128xf32>
      %c4_i32 = arith.constant 4 : i32
      %157 = arith.addi %16, %c4_i32 : i32
      %158 = arith.index_cast %157 : i32 to index
      %c0_34 = arith.constant 0 : index
      %159 = vector.load %arg3[%158, %c0_34] : memref<8x128xf32, #tpu.memory_space<vmem>>, vector<1x128xf32>
      %160 = vector.shape_cast %159 : vector<1x128xf32> to vector<128xf32>
      %c4_i32_35 = arith.constant 4 : i32
      %161 = arith.addi %16, %c4_i32_35 : i32
      %162 = arith.index_cast %161 : i32 to index
      %c0_36 = arith.constant 0 : index
      %163 = vector.load %arg4[%162, %c0_36] : memref<8x128xf32, #tpu.memory_space<vmem>>, vector<1x128xf32>
      %164 = vector.shape_cast %163 : vector<1x128xf32> to vector<128xf32>
      %cst_37 = arith.constant 1.000000e+00 : f32
      %165 = vector.broadcast %cst_37 : f32 to vector<128xf32>
      %166 = arith.addf %165, %164 : vector<128xf32>
      %167 = arith.mulf %156, %166 : vector<128xf32>
      %168 = arith.mulf %156, %164 : vector<128xf32>
      %cst_38 = arith.constant 1.000000e+00 : f32
      %169 = vector.broadcast %cst_38 : f32 to vector<128xf32>
      %170 = arith.addf %169, %168 : vector<128xf32>
      %171 = tpu.reciprocal %170 : vector<128xf32> -> vector<128xf32>
      %172 = arith.mulf %167, %171 : vector<128xf32>
      %173 = vector.broadcast %0 : f32 to vector<128xf32>
      %174 = arith.mulf %173, %160 : vector<128xf32>
      %175 = vector.broadcast %1 : f32 to vector<128xf32>
      %176 = arith.mulf %175, %172 : vector<128xf32>
      %177 = arith.addf %174, %176 : vector<128xf32>
      %178 = vector.broadcast %4 : f32 to vector<128xf32>
      %179 = arith.subf %177, %178 : vector<128xf32>
      %cst_39 = arith.constant 0.000000e+00 : f32
      %180 = vector.broadcast %cst_39 : f32 to vector<128xf32>
      %181 = arith.maximumf %179, %180 : vector<128xf32>
      %182 = vector.broadcast %2 : f32 to vector<128xf32>
      %183 = arith.mulf %182, %181 : vector<128xf32>
      %184 = vector.broadcast %5 : f32 to vector<128xf32>
      %185 = arith.addf %183, %184 : vector<128xf32>
      %cst_40 = arith.constant 0.000000e+00 : f32
      %186 = vector.broadcast %cst_40 : f32 to vector<128xf32>
      %187 = arith.maximumf %185, %186 : vector<128xf32>
      %188 = vector.broadcast %3 : f32 to vector<128xf32>
      %189 = arith.mulf %188, %187 : vector<128xf32>
      %190 = vector.broadcast %6 : f32 to vector<128xf32>
      %191 = arith.addf %189, %190 : vector<128xf32>
      %c5_i32 = arith.constant 5 : i32
      %192 = arith.addi %16, %c5_i32 : i32
      %193 = arith.index_cast %192 : i32 to index
      %c0_41 = arith.constant 0 : index
      %194 = vector.load %arg3[%193, %c0_41] : memref<8x128xf32, #tpu.memory_space<vmem>>, vector<1x128xf32>
      %195 = vector.shape_cast %194 : vector<1x128xf32> to vector<128xf32>
      %c5_i32_42 = arith.constant 5 : i32
      %196 = arith.addi %16, %c5_i32_42 : i32
      %197 = arith.index_cast %196 : i32 to index
      %c0_43 = arith.constant 0 : index
      %198 = vector.load %arg4[%197, %c0_43] : memref<8x128xf32, #tpu.memory_space<vmem>>, vector<1x128xf32>
      %199 = vector.shape_cast %198 : vector<1x128xf32> to vector<128xf32>
      %cst_44 = arith.constant 1.000000e+00 : f32
      %200 = vector.broadcast %cst_44 : f32 to vector<128xf32>
      %201 = arith.addf %200, %199 : vector<128xf32>
      %202 = arith.mulf %191, %201 : vector<128xf32>
      %203 = arith.mulf %191, %199 : vector<128xf32>
      %cst_45 = arith.constant 1.000000e+00 : f32
      %204 = vector.broadcast %cst_45 : f32 to vector<128xf32>
      %205 = arith.addf %204, %203 : vector<128xf32>
      %206 = tpu.reciprocal %205 : vector<128xf32> -> vector<128xf32>
      %207 = arith.mulf %202, %206 : vector<128xf32>
      %208 = vector.broadcast %0 : f32 to vector<128xf32>
      %209 = arith.mulf %208, %195 : vector<128xf32>
      %210 = vector.broadcast %1 : f32 to vector<128xf32>
      %211 = arith.mulf %210, %207 : vector<128xf32>
      %212 = arith.addf %209, %211 : vector<128xf32>
      %213 = vector.broadcast %4 : f32 to vector<128xf32>
      %214 = arith.subf %212, %213 : vector<128xf32>
      %cst_46 = arith.constant 0.000000e+00 : f32
      %215 = vector.broadcast %cst_46 : f32 to vector<128xf32>
      %216 = arith.maximumf %214, %215 : vector<128xf32>
      %217 = vector.broadcast %2 : f32 to vector<128xf32>
      %218 = arith.mulf %217, %216 : vector<128xf32>
      %219 = vector.broadcast %5 : f32 to vector<128xf32>
      %220 = arith.addf %218, %219 : vector<128xf32>
      %cst_47 = arith.constant 0.000000e+00 : f32
      %221 = vector.broadcast %cst_47 : f32 to vector<128xf32>
      %222 = arith.maximumf %220, %221 : vector<128xf32>
      %223 = vector.broadcast %3 : f32 to vector<128xf32>
      %224 = arith.mulf %223, %222 : vector<128xf32>
      %225 = vector.broadcast %6 : f32 to vector<128xf32>
      %226 = arith.addf %224, %225 : vector<128xf32>
      %c6_i32 = arith.constant 6 : i32
      %227 = arith.addi %16, %c6_i32 : i32
      %228 = arith.index_cast %227 : i32 to index
      %c0_48 = arith.constant 0 : index
      %229 = vector.load %arg3[%228, %c0_48] : memref<8x128xf32, #tpu.memory_space<vmem>>, vector<1x128xf32>
      %230 = vector.shape_cast %229 : vector<1x128xf32> to vector<128xf32>
      %c6_i32_49 = arith.constant 6 : i32
      %231 = arith.addi %16, %c6_i32_49 : i32
      %232 = arith.index_cast %231 : i32 to index
      %c0_50 = arith.constant 0 : index
      %233 = vector.load %arg4[%232, %c0_50] : memref<8x128xf32, #tpu.memory_space<vmem>>, vector<1x128xf32>
      %234 = vector.shape_cast %233 : vector<1x128xf32> to vector<128xf32>
      %cst_51 = arith.constant 1.000000e+00 : f32
      %235 = vector.broadcast %cst_51 : f32 to vector<128xf32>
      %236 = arith.addf %235, %234 : vector<128xf32>
      %237 = arith.mulf %226, %236 : vector<128xf32>
      %238 = arith.mulf %226, %234 : vector<128xf32>
      %cst_52 = arith.constant 1.000000e+00 : f32
      %239 = vector.broadcast %cst_52 : f32 to vector<128xf32>
      %240 = arith.addf %239, %238 : vector<128xf32>
      %241 = tpu.reciprocal %240 : vector<128xf32> -> vector<128xf32>
      %242 = arith.mulf %237, %241 : vector<128xf32>
      %243 = vector.broadcast %0 : f32 to vector<128xf32>
      %244 = arith.mulf %243, %230 : vector<128xf32>
      %245 = vector.broadcast %1 : f32 to vector<128xf32>
      %246 = arith.mulf %245, %242 : vector<128xf32>
      %247 = arith.addf %244, %246 : vector<128xf32>
      %248 = vector.broadcast %4 : f32 to vector<128xf32>
      %249 = arith.subf %247, %248 : vector<128xf32>
      %cst_53 = arith.constant 0.000000e+00 : f32
      %250 = vector.broadcast %cst_53 : f32 to vector<128xf32>
      %251 = arith.maximumf %249, %250 : vector<128xf32>
      %252 = vector.broadcast %2 : f32 to vector<128xf32>
      %253 = arith.mulf %252, %251 : vector<128xf32>
      %254 = vector.broadcast %5 : f32 to vector<128xf32>
      %255 = arith.addf %253, %254 : vector<128xf32>
      %cst_54 = arith.constant 0.000000e+00 : f32
      %256 = vector.broadcast %cst_54 : f32 to vector<128xf32>
      %257 = arith.maximumf %255, %256 : vector<128xf32>
      %258 = vector.broadcast %3 : f32 to vector<128xf32>
      %259 = arith.mulf %258, %257 : vector<128xf32>
      %260 = vector.broadcast %6 : f32 to vector<128xf32>
      %261 = arith.addf %259, %260 : vector<128xf32>
      %c7_i32 = arith.constant 7 : i32
      %262 = arith.addi %16, %c7_i32 : i32
      %263 = arith.index_cast %262 : i32 to index
      %c0_55 = arith.constant 0 : index
      %264 = vector.load %arg3[%263, %c0_55] : memref<8x128xf32, #tpu.memory_space<vmem>>, vector<1x128xf32>
      %265 = vector.shape_cast %264 : vector<1x128xf32> to vector<128xf32>
      %c7_i32_56 = arith.constant 7 : i32
      %266 = arith.addi %16, %c7_i32_56 : i32
      %267 = arith.index_cast %266 : i32 to index
      %c0_57 = arith.constant 0 : index
      %268 = vector.load %arg4[%267, %c0_57] : memref<8x128xf32, #tpu.memory_space<vmem>>, vector<1x128xf32>
      %269 = vector.shape_cast %268 : vector<1x128xf32> to vector<128xf32>
      %cst_58 = arith.constant 1.000000e+00 : f32
      %270 = vector.broadcast %cst_58 : f32 to vector<128xf32>
      %271 = arith.addf %270, %269 : vector<128xf32>
      %272 = arith.mulf %261, %271 : vector<128xf32>
      %273 = arith.mulf %261, %269 : vector<128xf32>
      %cst_59 = arith.constant 1.000000e+00 : f32
      %274 = vector.broadcast %cst_59 : f32 to vector<128xf32>
      %275 = arith.addf %274, %273 : vector<128xf32>
      %276 = tpu.reciprocal %275 : vector<128xf32> -> vector<128xf32>
      %277 = arith.mulf %272, %276 : vector<128xf32>
      %278 = vector.broadcast %0 : f32 to vector<128xf32>
      %279 = arith.mulf %278, %265 : vector<128xf32>
      %280 = vector.broadcast %1 : f32 to vector<128xf32>
      %281 = arith.mulf %280, %277 : vector<128xf32>
      %282 = arith.addf %279, %281 : vector<128xf32>
      %283 = vector.broadcast %4 : f32 to vector<128xf32>
      %284 = arith.subf %282, %283 : vector<128xf32>
      %cst_60 = arith.constant 0.000000e+00 : f32
      %285 = vector.broadcast %cst_60 : f32 to vector<128xf32>
      %286 = arith.maximumf %284, %285 : vector<128xf32>
      %287 = vector.broadcast %2 : f32 to vector<128xf32>
      %288 = arith.mulf %287, %286 : vector<128xf32>
      %289 = vector.broadcast %5 : f32 to vector<128xf32>
      %290 = arith.addf %288, %289 : vector<128xf32>
      %cst_61 = arith.constant 0.000000e+00 : f32
      %291 = vector.broadcast %cst_61 : f32 to vector<128xf32>
      %292 = arith.maximumf %290, %291 : vector<128xf32>
      %293 = vector.broadcast %3 : f32 to vector<128xf32>
      %294 = arith.mulf %293, %292 : vector<128xf32>
      %295 = vector.broadcast %6 : f32 to vector<128xf32>
      %296 = arith.addf %294, %295 : vector<128xf32>
      %297 = vector.shape_cast %51 : vector<128xf32> to vector<1x128xf32>
      %298 = vector.shape_cast %86 : vector<128xf32> to vector<1x128xf32>
      %299 = vector.shape_cast %121 : vector<128xf32> to vector<1x128xf32>
      %300 = vector.shape_cast %156 : vector<128xf32> to vector<1x128xf32>
      %301 = vector.shape_cast %191 : vector<128xf32> to vector<1x128xf32>
      %302 = vector.shape_cast %226 : vector<128xf32> to vector<1x128xf32>
      %303 = vector.shape_cast %261 : vector<128xf32> to vector<1x128xf32>
      %304 = vector.shape_cast %296 : vector<128xf32> to vector<1x128xf32>
      %305 = tpu.concatenate %297, %298, %299, %300, %301, %302, %303, %304 in 0 : vector<1x128xf32>, vector<1x128xf32>, vector<1x128xf32>, vector<1x128xf32>, vector<1x128xf32>, vector<1x128xf32>, vector<1x128xf32>, vector<1x128xf32> -> vector<8x128xf32>
      %306 = arith.index_cast %16 : i32 to index
      %c0_62 = arith.constant 0 : index
      %307 = vector.load %arg5[%306, %c0_62] : memref<8x128xf32, #tpu.memory_space<vmem>>, vector<8x128xf32>
      tpu.vector_store %arg5[%306, %c0_62], %305 {strides = array<i32>} : memref<8x128xf32, #tpu.memory_space<vmem>>, vector<8x128xf32>,
      %c1_i32_63 = arith.constant 1 : i32
      %c0_64 = arith.constant 0 : index
      %c0_65 = arith.constant 0 : index
      %308 = vector.load %arg6[%c0_64, %c0_65] : memref<1x128xf32, #tpu.memory_space<vmem>>, vector<1x128xf32>
      %309 = vector.shape_cast %308 : vector<1x128xf32> to vector<128xf32>
      %310 = vector.shape_cast %296 : vector<128xf32> to vector<1x128xf32>
      tpu.vector_store %arg6[%c0_64, %c0_65], %310 {strides = array<i32>} : memref<1x128xf32, #tpu.memory_space<vmem>>, vector<1x128xf32>,
    } else {
    }
    return
  }
  func.func @transform_0(%arg0: i32, %arg1: i32, %arg2: memref<7xf32, #tpu.memory_space<smem>>) -> (i32, i32) {
    %c0_i32 = arith.constant 0 : i32
    return %arg1, %arg0 : i32, i32
  }
  func.func @transform_1(%arg0: i32, %arg1: i32, %arg2: memref<7xf32, #tpu.memory_space<smem>>) -> (i32, i32) {
    %c0_i32 = arith.constant 0 : i32
    return %arg1, %arg0 : i32, i32
  }
  func.func @transform_2(%arg0: i32, %arg1: i32, %arg2: memref<7xf32, #tpu.memory_space<smem>>) -> (i32, i32) {
    %c0_i32 = arith.constant 0 : i32
    return %arg1, %arg0 : i32, i32
  }
}

</mosaic_0001>

<bundles_post_ra>
// kernel: _notrade_rnn_pallas.1
= control target key start
LH: loop header
LB: loop body
LE: loop exit
PB: predicated region body
PF: predicated region fallthrough
CT: control target
= control target key end

     0   :  { %s715_s0 = inlined_call_operand.hbm [shape: f32[7], index: 0, kind: input, shape index: {}]   ;;  %s716_s1 = inlined_call_operand.hbm [shape: f32[8,128], index: 1, kind: input, shape index: {}]   ;;  %s717_s2 = inlined_call_operand.hbm [shape: f32[8,128], index: 2, kind: input, shape index: {}]   ;;  %s718_s3 = inlined_call_operand.hbm [shape: f32[8,128], index: 3, kind: output, shape index: {}]  }
   0x1   :  { %s491_s14 = scalar_lea.hbm %s715_s0, 16 }
   0x2   :  { %p492_p0 = scmp.ne.s32.totalorder %s715_s0, %s491_s14  ;;  %p495_p1 = scmp.lt.u32.totalorder %s491_s14, %s715_s0 }
   0x4   :  { %p497_p2 = pnand %p495_p1, %p492_p0 }
   0x6   :  { %500 = shalt.err (!%p497_p2)  }
   0x7   :  { %s575_s19 = smov [#allocation4]  }
   0x8   :  { %9 = dma.hbm_to_smem %s715_s0, 16, %s575_s19, [#allocation3] }
   0x9   :  { %567 = dma.done.wait [#allocation3], 16 }
   0xa   :  { %568 = vsyncadd [#allocation3], 4294967280 }
   0xb   :  { %11 = sfence }
   0xc   :  { %12 = vsyncpa [#allocation6], 0 }
   0xd   :  { %13 = vsyncpa [#allocation9], 0 }
   0xe   :  { %14 = vsyncpa [#allocation7], 0  ;;  %s576_s22 = smov [#allocation5]   ;;  %s577_s24 = smov [#allocation8]  }
   0xf   :  { %s21_s23 = sshll.u32 %s576_s22, 4  ;;  %s31_s25 = sshll.u32 %s577_s24, 4  ;;  %s22_s23 = int_to_ptr.vmem [resolvable:$true] %s21_s23  ;;  %s32_s25 = int_to_ptr.vmem [resolvable:$true] %s31_s25 }
  0x10   :  { %s501_s28 = scalar_lea.hbm %s716_s1, 128 }
  0x11   :  { %p502_p3 = scmp.ne.s32.totalorder %s716_s1, %s501_s28  ;;  %p505_p4 = scmp.lt.u32.totalorder %s501_s28, %s716_s1 }
  0x13   :  { %p507_p5 = pnand %p505_p4, %p502_p3 }
  0x15   :  { %510 = shalt.err (!%p507_p5)
}
  0x16   :  { %s511_s5 = scalar_lea.vmem %s22_s23, 128  ;;  %p516_p7 = scmp.lt.s32.totalorder %s22_s23, %s22_s23 }
  0x17   :  { %p512_p6 = scmp.ne.s32.totalorder %s22_s23, %s511_s5  ;;  %p517_p8 = scmp.lt.s32.totalorder %s511_s5, %s511_s5 }
  0x19   :  { %p518_p9 = por %p517_p8, %p516_p7 }
  0x1b   :  { %p519_p10 = pnand %p518_p9, %p512_p6 }
  0x1d   :  { %522 = shalt.err (!%p519_p10)
}
  0x1e   :  { %24 = dma.hbm_to_vmem [thread:$0]  %s716_s1, 128, %s22_s23, [#allocation6]  }
  0x1f   :  { %s523_s10 = scalar_lea.hbm %s717_s2, 128 }
  0x20   :  { %p524_p11 = scmp.ne.s32.totalorder %s717_s2, %s523_s10  ;;  %p527_p12 = scmp.lt.u32.totalorder %s523_s10, %s717_s2 }
  0x22   :  { %p529_p13 = pnand %p527_p12, %p524_p11 }
  0x24   :  { %532 = shalt.err (!%p529_p13)
}
  0x25   :  { %s533_s15 = scalar_lea.vmem %s32_s25, 128  ;;  %p538_p1 = scmp.lt.s32.totalorder %s32_s25, %s32_s25 }
  0x26   :  { %p534_p0 = scmp.ne.s32.totalorder %s32_s25, %s533_s15  ;;  %p539_p2 = scmp.lt.s32.totalorder %s533_s15, %s533_s15 }
  0x28   :  { %p540_p3 = por %p539_p2, %p538_p1 }
  0x2a   :  { %p541_p4 = pnand %p540_p3, %p534_p0 }
  0x2c   :  { %544 = shalt.err (!%p541_p4)
}
  0x2d   :  { %34 = dma.hbm_to_vmem [thread:$0]  %s717_s2, 128, %s32_s25, [#allocation9]  }
  0x2e   :  { %569 = dma.done.wait [#allocation6], 128  }
  0x2f   :  { %570 = vsyncadd [#allocation6], 4294967168 }
  0x30   :  { %571 = dma.done.wait [#allocation9], 128  }
  0x31   :  { %572 = vsyncadd [#allocation9], 4294967168  ;;  %v635_v0 = vld [vmem:[#allocation5] sm:$0x1]  ;;  %v54_v1 = vld [vmem:[#allocation8 + $0x1] sm:$0x1] }
  0x32   :  { %v57_v2 = vmul.f32 %v54_v1, %v635_v0  ;;  %s41_s17 = sld [smem:[#allocation4]]  ;;  %s467_s18 = sld [smem:[#allocation4 + $0x1]]  ;;  %v55_v4 = vadd.f32 1.0, %v54_v1  ;;  %v53_v6 = vld [vmem:[#allocation5 + $0x1] sm:$0x1]  ;;  %vm207_vm0 = vcmask 1040384  }
  0x33   :  { %s470_s19 = sld [smem:[#allocation4 + $0x4]]  ;;  %s468_s2 = sld [smem:[#allocation4 + $0x2]]  ;;  %v79_v25 = vld [vmem:[#allocation8 + $0x2] sm:$0x1]  ;;  %v78_v31 = vld [vmem:[#allocation5 + $0x2] sm:$0x1] }
  0x34   :  { %v58_v3 = vadd.f32 1.0, %v57_v2  ;;  %v56_v5 = vmul.f32 %v55_v4, %v635_v0  ;;  %s471_s20 = sld [smem:[#allocation4 + $0x5]]  ;;  %s469_s21 = sld [smem:[#allocation4 + $0x3]]  ;;  %v80_v29 = vadd.f32 1.0, %v79_v25  ;;  %v97_v43 = vld [vmem:[#allocation8 + $0x3] sm:$0x1] }
  0x35   :  { %s472_s22 = sld [smem:[#allocation4 + $0x6]]  ;;  %v98_v47 = vadd.f32 1.0, %v97_v43  ;;  %v96_v49 = vld [vmem:[#allocation5 + $0x3] sm:$0x1]  ;;  %v115_v61 = vld [vmem:[#allocation8 + $0x4] sm:$0x1] }
  0x36   :  { %477 = vrcp.f32 %v58_v3  ;;  %v116_v3 = vadd.f32 1.0, %v115_v61  ;;  %vm209_vm1 = vcmask 1041408   ;;  %vm211_vm2 = vcmask 1042432   ;;  %s578_s23 = smov [#allocation10]  }
  0x37   :  { %vm213_vm3 = vcmask 1043456   ;;  %vm215_vm4 = vcmask 1044480   ;;  %vm217_vm5 = vcmask 1045504   ;;  %s443_s24 = sshll.u32 %s578_s23, 4  ;;  %vm219_vm6 = vcmask 1046528   ;;  %s444_s24 = int_to_ptr.vmem [resolvable:$true] %s443_s24 }
  0x38   :  { %v639_v7 = vstv %s41_s17  ;;  %v641_v9 = vstv %s467_s18  ;;  %s545_s25 = scalar_lea.vmem %s444_s24, 128  ;;  %p550_p6 = scmp.lt.s32.totalorder %s444_s24, %s444_s24 }
  0x39   :  { %v62_v11 = vmul.f32 %v639_v7, %v53_v6  ;;  %v645_v13 = vstv %s470_s19  ;;  %v648_v16 = vstv %s468_s2  ;;  %v86_v34 = vmul.f32 %v78_v31, %v639_v7  ;;  %p546_p5 = scmp.ne.s32.totalorder %s444_s24, %s545_s25  ;;  %p551_p7 = scmp.lt.s32.totalorder %s545_s25, %s545_s25 }
  0x3a   :  { %v650_v18 = vstv %s471_s20  ;;  %v654_v21 = vstv %s469_s21  ;;  %v104_v52 = vmul.f32 %v96_v49, %v639_v7 }
  0x3b   :  { %v656_v23 = vstv %s472_s22  ;;  %p552_p8 = por %p551_p7, %p550_p6 }
  0x3d   :  { %p553_p9 = pnand %p552_p8, %p546_p5 }
  0x40   :  { %v478_v8 = vpop.eup %477 }
  0x41   :  { %v60_v10 = vmul.f32 %v478_v8, %v56_v5 }
  0x43   :  { %v64_v12 = vmul.f32 %v641_v9, %v60_v10 }
  0x45   :  { %v65_v14 = vadd.f32 %v64_v12, %v62_v11  ;;  %v114_v12 = vld [vmem:[#allocation5 + $0x4] sm:$0x1] }
  0x47   :  { %v67_v15 = vsub.f32 %v65_v14, %v645_v13 }
  0x49   :  { %v68_v17 = vmax.f32 %v67_v15, 0.0 }
  0x4b   :  { %v70_v19 = vmul.f32 %v648_v16, %v68_v17  ;;  %v122_v17 = vmul.f32 %v114_v12, %v639_v7 }
  0x4d   :  { %v72_v20 = vadd.f32 %v650_v18, %v70_v19 }
  0x4f   :  { %v73_v22 = vmax.f32 %v72_v20, 0.0 }
  0x51   :  { %v75_v24 = vmul.f32 %v654_v21, %v73_v22 }
  0x53   :  { %v77_v26 = vadd.f32 %v656_v23, %v75_v24 }
  0x55   :  { %v82_v27 = vmul.f32 %v79_v25, %v77_v26  ;;  %v81_v30 = vmul.f32 %v80_v29, %v77_v26  ;;  %v187_v2 = vrot.slane %v77_v26, 7 }
  0x57   :  { %v83_v28 = vadd.f32 1.0, %v82_v27  ;;  %v208_v6 = vsel %vm207_vm0, %v635_v0, %v187_v2 }
  0x59   :  { %479 = vrcp.f32 %v83_v28  ;;  %v133_v28 = vld [vmem:[#allocation8 + $0x5] sm:$0x1] }
  0x63   :  { %v480_v32 = vpop.eup %479 }
  0x64   :  { %v85_v33 = vmul.f32 %v480_v32, %v81_v30 }
  0x66   :  { %v87_v35 = vmul.f32 %v85_v33, %v641_v9 }
  0x68   :  { %v88_v36 = vadd.f32 %v87_v35, %v86_v34  ;;  %v134_v34 = vadd.f32 1.0, %v133_v28 }
  0x6a   :  { %v89_v37 = vsub.f32 %v88_v36, %v645_v13  ;;  %v132_v36 = vld [vmem:[#allocation5 + $0x5] sm:$0x1] }
  0x6c   :  { %v90_v38 = vmax.f32 %v89_v37, 0.0 }
  0x6e   :  { %v91_v39 = vmul.f32 %v90_v38, %v648_v16 }
  0x70   :  { %v92_v40 = vadd.f32 %v91_v39, %v650_v18  ;;  %v140_v39 = vmul.f32 %v132_v36, %v639_v7 }
  0x72   :  { %v93_v41 = vmax.f32 %v92_v40, 0.0 }
  0x74   :  { %v94_v42 = vmul.f32 %v93_v41, %v654_v21 }
  0x76   :  { %v95_v44 = vadd.f32 %v94_v42, %v656_v23 }
  0x78   :  { %v100_v45 = vmul.f32 %v97_v43, %v95_v44  ;;  %v99_v48 = vmul.f32 %v98_v47, %v95_v44  ;;  %v190_v4 = vrot.slane %v95_v44, 6 }
  0x7a   :  { %v101_v46 = vadd.f32 1.0, %v100_v45  ;;  %v210_v8 = vsel %vm209_vm1, %v208_v6, %v190_v4 }
  0x7c   :  { %481 = vrcp.f32 %v101_v46 }
  0x86   :  { %v482_v50 = vpop.eup %481 }
  0x87   :  { %v103_v51 = vmul.f32 %v482_v50, %v99_v48  ;;  %v151_v48 = vld [vmem:[#allocation8 + $0x6] sm:$0x1] }
  0x89   :  { %v105_v53 = vmul.f32 %v103_v51, %v641_v9 }
  0x8b   :  { %v106_v54 = vadd.f32 %v105_v53, %v104_v52 }
  0x8d   :  { %v107_v55 = vsub.f32 %v106_v54, %v645_v13  ;;  %v152_v54 = vadd.f32 1.0, %v151_v48 }
  0x8f   :  { %v108_v56 = vmax.f32 %v107_v55, 0.0 }
  0x91   :  { %v109_v57 = vmul.f32 %v108_v56, %v648_v16  ;;  %v150_v56 = vld [vmem:[#allocation5 + $0x6] sm:$0x1] }
  0x93   :  { %v110_v58 = vadd.f32 %v109_v57, %v650_v18 }
  0x95   :  { %v111_v59 = vmax.f32 %v110_v58, 0.0 }
  0x97   :  { %v112_v60 = vmul.f32 %v111_v59, %v654_v21  ;;  %v158_v59 = vmul.f32 %v150_v56, %v639_v7 }
  0x99   :  { %v113_v62 = vadd.f32 %v112_v60, %v656_v23 }
  0x9b   :  { %v118_v63 = vmul.f32 %v115_v61, %v113_v62  ;;  %v193_v5 = vrot.slane %v113_v62, 5  ;;  %v117_v11 = vmul.f32 %v116_v3, %v113_v62 }
  0x9d   :  { %v119_v1 = vadd.f32 1.0, %v118_v63  ;;  %v212_v10 = vsel %vm211_vm2, %v210_v8, %v193_v5  ;;  %v169_v5 = vld [vmem:[#allocation8 + $0x7] sm:$0x1] }
  0x9f   :  { %483 = vrcp.f32 %v119_v1 }
  0xa9   :  { %v484_v14 = vpop.eup %483 }
  0xaa   :  { %v121_v15 = vmul.f32 %v484_v14, %v117_v11  ;;  %v170_v11 = vadd.f32 1.0, %v169_v5  ;;  %v168_v14 = vld [vmem:[#allocation5 + $0x7] sm:$0x1] }
  0xac   :  { %v123_v19 = vmul.f32 %v121_v15, %v641_v9 }
  0xae   :  { %v124_v20 = vadd.f32 %v123_v19, %v122_v17  ;;  %v176_v19 = vmul.f32 %v168_v14, %v639_v7 }
  0xb0   :  { %v125_v22 = vsub.f32 %v124_v20, %v645_v13 }
  0xb2   :  { %v126_v24 = vmax.f32 %v125_v22, 0.0 }
  0xb4   :  { %v127_v25 = vmul.f32 %v126_v24, %v648_v16 }
  0xb6   :  { %v128_v0 = vadd.f32 %v127_v25, %v650_v18 }
  0xb8   :  { %v129_v26 = vmax.f32 %v128_v0, 0.0 }
  0xba   :  { %v130_v27 = vmul.f32 %v129_v26, %v654_v21 }
  0xbc   :  { %v131_v29 = vadd.f32 %v130_v27, %v656_v23 }
  0xbe   :  { %v136_v30 = vmul.f32 %v133_v28, %v131_v29  ;;  %v196_v31 = vrot.slane %v131_v29, 4  ;;  %v135_v35 = vmul.f32 %v134_v34, %v131_v29 }
  0xc0   :  { %v137_v32 = vadd.f32 1.0, %v136_v30  ;;  %v214_v33 = vsel %vm213_vm3, %v212_v10, %v196_v31 }
  0xc2   :  { %485 = vrcp.f32 %v137_v32 }
  0xcc   :  { %v486_v37 = vpop.eup %485 }
  0xcd   :  { %v139_v38 = vmul.f32 %v486_v37, %v135_v35 }
  0xcf   :  { %v141_v40 = vmul.f32 %v139_v38, %v641_v9 }
  0xd1   :  { %v142_v41 = vadd.f32 %v141_v40, %v140_v39 }
  0xd3   :  { %v143_v42 = vsub.f32 %v142_v41, %v645_v13 }
  0xd5   :  { %v144_v43 = vmax.f32 %v143_v42, 0.0 }
  0xd7   :  { %v145_v44 = vmul.f32 %v144_v43, %v648_v16 }
  0xd9   :  { %v146_v45 = vadd.f32 %v145_v44, %v650_v18 }
  0xdb   :  { %v147_v46 = vmax.f32 %v146_v45, 0.0 }
  0xdd   :  { %v148_v47 = vmul.f32 %v147_v46, %v654_v21 }
  0xdf   :  { %v149_v49 = vadd.f32 %v148_v47, %v656_v23 }
  0xe1   :  { %v154_v50 = vmul.f32 %v151_v48, %v149_v49  ;;  %v199_v51 = vrot.slane %v149_v49, 3  ;;  %v153_v55 = vmul.f32 %v152_v54, %v149_v49 }
  0xe3   :  { %v155_v52 = vadd.f32 1.0, %v154_v50  ;;  %v216_v53 = vsel %vm215_vm4, %v214_v33, %v199_v51 }
  0xe5   :  { %487 = vrcp.f32 %v155_v52 }
  0xef   :  { %v488_v57 = vpop.eup %487 }
  0xf0   :  { %v157_v58 = vmul.f32 %v488_v57, %v153_v55 }
  0xf2   :  { %v159_v60 = vmul.f32 %v157_v58, %v641_v9 }
  0xf4   :  { %v160_v61 = vadd.f32 %v159_v60, %v158_v59 }
  0xf6   :  { %v161_v62 = vsub.f32 %v160_v61, %v645_v13 }
  0xf8   :  { %v162_v63 = vmax.f32 %v161_v62, 0.0 }
  0xfa   :  { %v163_v1 = vmul.f32 %v162_v63, %v648_v16 }
  0xfc   :  { %v164_v2 = vadd.f32 %v163_v1, %v650_v18 }
  0xfe   :  { %v165_v3 = vmax.f32 %v164_v2, 0.0 }
 0x100   :  { %v166_v4 = vmul.f32 %v165_v3, %v654_v21 }
 0x102   :  { %v167_v6 = vadd.f32 %v166_v4, %v656_v23 }
 0x104   :  { %v172_v8 = vmul.f32 %v169_v5, %v167_v6  ;;  %v171_v12 = vmul.f32 %v170_v11, %v167_v6  ;;  %v202_v28 = vrot.slane %v167_v6, 2 }
 0x106   :  { %v173_v10 = vadd.f32 1.0, %v172_v8  ;;  %v218_v7 = vsel %vm217_vm5, %v216_v53, %v202_v28 }
 0x108   :  { %489 = vrcp.f32 %v173_v10 }
 0x112   :  { %v490_v15 = vpop.eup %489 }
 0x113   :  { %v175_v17 = vmul.f32 %v490_v15, %v171_v12 }
 0x115   :  { %v177_v20 = vmul.f32 %v175_v17, %v641_v9 }
 0x117   :  { %v178_v22 = vadd.f32 %v177_v20, %v176_v19 }
 0x119   :  { %v179_v24 = vsub.f32 %v178_v22, %v645_v13 }
 0x11b   :  { %v180_v25 = vmax.f32 %v179_v24, 0.0 }
 0x11d   :  { %v181_v0 = vmul.f32 %v180_v25, %v648_v16 }
 0x11f   :  { %v182_v26 = vadd.f32 %v181_v0, %v650_v18 }
 0x121   :  { %v183_v27 = vmax.f32 %v182_v26, 0.0 }
 0x123   :  { %v184_v29 = vmul.f32 %v183_v27, %v654_v21 }
 0x125   :  { %v185_v30 = vadd.f32 %v184_v29, %v656_v23 }
 0x127   :  { %v205_v9 = vrot.slane %v185_v30, 1 }
 0x129   :  { %v220_v31 = vsel %vm219_vm6, %v218_v7, %v205_v9 }
 0x12a   :  { %221 = vst [vmem:[#allocation10] sm:$0xff] %v220_v31 }
 0x12b   :  { %556 = shalt.err (!%p553_p9)
}
 0x12c   :  { %s557_s28 = scalar_lea.hbm %s718_s3, 128 }
 0x12d   :  { %p558_p10 = scmp.ne.s32.totalorder %s718_s3, %s557_s28  ;;  %p561_p11 = scmp.lt.u32.totalorder %s557_s28, %s718_s3 }
 0x12f   :  { %p563_p12 = pnand %p561_p11, %p558_p10 }
 0x131   :  { %566 = shalt.err (!%p563_p12)
}
 0x132   :  { %446 = dma.vmem_to_hbm [thread:$0]  %s444_s24, 128, %s718_s3, [#allocation7]  }
 0x133   :  { %573 = dma.done.wait [#allocation7], 128  }
 0x134   :  { %574 = vsyncadd [#allocation7], 4294967168 }
 0x135   :  { %450 = vsyncpa [#allocation6], 1 }
 0x136   :  { %451 = vsyncpa [#allocation9], 1 }
 0x137   :  { %452 = vsyncpa [#allocation7], 1 }

</bundles_post_ra>
